<compile_context>
chip_gen: v5e
topology: v5e:2x2
jax: 0.10.0
libtpu: 0.0.40
codegen_flags: <defaults>
</compile_context>

<pallas_src>
import functools

import jax
import jax.numpy as jnp
from jax import lax
from jax.experimental import pallas as pl
from jax.experimental.pallas import tpu as pltpu


# ---------------------------------------------------------------------------
# Kernels
# ---------------------------------------------------------------------------
def lstm_dir_kernel(x_ref, wih_ref, whh_ref, b_ref, y_ref, *, hidden_dim):
    """One direction of one LSTM layer over the full (time-major) sequence.

    x_ref  : (T, B, I)  input sequence (already time-reversed for the bwd dir)
    wih_ref: (I, 4H)    input->gates weight, pre-transposed
    whh_ref: (H, 4H)    hidden->gates weight, pre-transposed
    b_ref  : (1, 4H)    b_ih + b_hh
    y_ref  : (T, B, H)  per-step hidden states (in processing order)
    """
    T, B, _ = x_ref.shape
    H = hidden_dim

    wih = wih_ref[...]
    whh = whh_ref[...]
    b = b_ref[...]

    h = jnp.zeros((B, H), dtype=jnp.float32)
    c = jnp.zeros((B, H), dtype=jnp.float32)

    # T is a small static trip count -> fully unrolled loop with static indices.
    # TODO(synk): for long sequences switch to lax.fori_loop(..., unroll=k).
    for t in range(T):
        x_t = x_ref[t]                                                # (B, I)
        gates = (jnp.dot(x_t, wih, preferred_element_type=jnp.float32)
                 + jnp.dot(h, whh, preferred_element_type=jnp.float32)
                 + b)                                                 # (B, 4H)
        i_g = jax.nn.sigmoid(gates[:, 0 * H:1 * H])
        f_g = jax.nn.sigmoid(gates[:, 1 * H:2 * H])
        g_g = jnp.tanh(gates[:, 2 * H:3 * H])
        o_g = jax.nn.sigmoid(gates[:, 3 * H:4 * H])
        c = f_g * c + i_g * g_g
        h = o_g * jnp.tanh(c)
        y_ref[t] = h.astype(y_ref.dtype)


def linear_head_kernel(x_ref, w_ref, b_ref, o_ref):
    """nn.Linear(2H, 1): VPU multiply + lane reduce (avoid MXU matvec for N=1)."""
    x = x_ref[...]                                    # (B, 2H)  VMEM
    w = w_ref[...]                                    # (1, 2H)  VMEM
    acc = jnp.sum(x * w, axis=-1, keepdims=True)      # (B, 1)
    o_ref[...] = (acc + b_ref[0, 0]).astype(o_ref.dtype)   # bias scalar from SMEM


# ---------------------------------------------------------------------------
# Pallas wrappers
# ---------------------------------------------------------------------------
def lstm_bidir_layer(x_dirs, wih_s, whh_s, b_s, *, hidden_dim):
    """x_dirs: (2, T, B, I) with dir 0 in forward order, dir 1 time-reversed.
    Returns (2, T, B, H) hidden states in each direction's processing order."""
    _, T, B, I = x_dirs.shape
    H = hidden_dim
    kernel = functools.partial(lstm_dir_kernel, hidden_dim=H)
    return pl.pallas_call(
        kernel,
        out_shape=jax.ShapeDtypeStruct((2, T, B, H), jnp.float32),
        grid=(2,),
        in_specs=[
            pl.BlockSpec((None, T, B, I), lambda d: (d, 0, 0, 0)),      # x
            pl.BlockSpec((None, I, 4 * H), lambda d: (d, 0, 0)),        # w_ih
            pl.BlockSpec((None, H, 4 * H), lambda d: (d, 0, 0)),        # w_hh
            pl.BlockSpec((None, 1, 4 * H), lambda d: (d, 0, 0)),        # bias
        ],
        out_specs=pl.BlockSpec((None, T, B, H), lambda d: (d, 0, 0, 0)),
        compiler_params=pltpu.CompilerParams(
            dimension_semantics=("parallel",),   # 2 directions -> 2 TCs on v7x
        ),
    )(x_dirs, wih_s, whh_s, b_s)


def linear_head(feat, w, b):
    B, _ = feat.shape
    return pl.pallas_call(
        linear_head_kernel,
        out_shape=jax.ShapeDtypeStruct((B, 1), feat.dtype),
        in_specs=[
            pl.BlockSpec(memory_space=pltpu.MemorySpace.VMEM),
            pl.BlockSpec(memory_space=pltpu.MemorySpace.VMEM),
            pl.BlockSpec(memory_space=pltpu.MemorySpace.SMEM),   # scalar bias
        ],
        out_specs=pl.BlockSpec(memory_space=pltpu.MemorySpace.VMEM),
    )(feat, w, b.reshape(1, 1))


def lstm_forward(text, lstm_params, lin_w, lin_b, *, hidden_dim):
    """Forward pass of the PyTorch module. text: [B, T, D] -> logits [B, 1]."""
    B, T, D = text.shape
    H = hidden_dim
    x = jnp.transpose(text, (1, 0, 2))                 # time-major (T, B, D)
    y = None
    for (wih_s, whh_s, b_s) in lstm_params:
        x_dirs = jnp.stack([x, x[::-1]], axis=0)       # (2, T, B, I)
        y = lstm_bidir_layer(x_dirs, wih_s, whh_s, b_s, hidden_dim=H)
        # Next-layer input: concat(fwd, time-reversed bwd) along features.
        x = jnp.concatenate([y[0], y[1][::-1]], axis=-1)   # (T, B, 2H)
        # TODO(synk): inter-layer dropout omitted (eval-mode forward).
    nor_out = y[0][T - 1]      # == out[:, -1, :H]
    rev_out = y[1][T - 1]      # == out[:,  0, H:]  (backward dir final state)
    feat = jnp.concatenate([nor_out, rev_out], axis=-1)    # (B, 2H)
    return linear_head(feat, lin_w, lin_b)
    # predict() = round(sigmoid(forward(text))) is a trivial elementwise epilogue.


# ---------------------------------------------------------------------------
# Pure-JAX reference (same math, PyTorch LSTM gate order i,f,g,o)
# ---------------------------------------------------------------------------
def lstm_forward_ref(text, lstm_params, lin_w, lin_b, *, hidden_dim):
    B, T, D = text.shape
    H = hidden_dim
    hi = lax.Precision.HIGHEST
    x = jnp.transpose(text, (1, 0, 2))
    y_dirs = None
    for (wih_s, whh_s, b_s) in lstm_params:
        y_dirs = []
        for d in range(2):
            wih, whh, b = wih_s[d], whh_s[d], b_s[d]
            xs = x if d == 0 else x[::-1]
            h = jnp.zeros((B, H), jnp.float32)
            c = jnp.zeros((B, H), jnp.float32)
            hs = []
            for t in range(T):
                gates = (jnp.dot(xs[t], wih, precision=hi)
                         + jnp.dot(h, whh, precision=hi) + b)
                i_g = jax.nn.sigmoid(gates[:, :H])
                f_g = jax.nn.sigmoid(gates[:, H:2 * H])
                g_g = jnp.tanh(gates[:, 2 * H:3 * H])
                o_g = jax.nn.sigmoid(gates[:, 3 * H:])
                c = f_g * c + i_g * g_g
                h = o_g * jnp.tanh(c)
                hs.append(h)
            y_dirs.append(jnp.stack(hs))   # processing order
        x = jnp.concatenate([y_dirs[0], y_dirs[1][::-1]], axis=-1)
    nor_out = y_dirs[0][T - 1]
    rev_out = y_dirs[1][T - 1]
    feat = jnp.concatenate([nor_out, rev_out], axis=-1)
    return jnp.dot(feat, lin_w.T, precision=hi) + lin_b[None, :]


# ---------------------------------------------------------------------------
# Parameter init (matches nn.LSTM / nn.Linear U(-1/sqrt(H), 1/sqrt(H)) style)
# ---------------------------------------------------------------------------
def init_params(key, D, H, n_layers):
    bound = 1.0 / float(H) ** 0.5
    lstm_params = []
    for layer in range(n_layers):
        in_dim = D if layer == 0 else 2 * H
        wih_l, whh_l, b_l = [], [], []
        for _ in range(2):                       # forward, backward
            key, k1, k2, k3, k4 = jax.random.split(key, 5)
            wih_l.append(jax.random.uniform(k1, (in_dim, 4 * H), jnp.float32,
                                            -bound, bound))          # pre-transposed
            whh_l.append(jax.random.uniform(k2, (H, 4 * H), jnp.float32,
                                            -bound, bound))          # pre-transposed
            b_ih = jax.random.uniform(k3, (4 * H,), jnp.float32, -bound, bound)
            b_hh = jax.random.uniform(k4, (4 * H,), jnp.float32, -bound, bound)
            b_l.append((b_ih + b_hh).reshape(1, 4 * H))               # pre-summed
        lstm_params.append((jnp.stack(wih_l), jnp.stack(whh_l), jnp.stack(b_l)))
    key, kw, kb = jax.random.split(key, 3)
    bound_l = 1.0 / float(2 * H) ** 0.5
    lin_w = jax.random.uniform(kw, (1, 2 * H), jnp.float32, -bound_l, bound_l)
    lin_b = jax.random.uniform(kb, (1,), jnp.float32, -bound_l, bound_l)
    return lstm_params, lin_w, lin_b, key


if __name__ == "__main__":
    key = jax.random.PRNGKey(0)
    B, T, D, H, L = 8, 8, 32, 32, 2   # batch, seq, embedding_dim, hidden_dim, n_layers

    lstm_params, lin_w, lin_b, key = init_params(key, D, H, L)
    key, kx = jax.random.split(key)
    text = jax.random.normal(kx, (B, T, D), jnp.float32)

    fwd = jax.jit(functools.partial(lstm_forward, hidden_dim=H))
    out = jax.block_until_ready(fwd(text, lstm_params, lin_w, lin_b))

    ref = lstm_forward_ref(text, lstm_params, lin_w, lin_b, hidden_dim=H)
    assert out.shape == (B, 1)
    assert jnp.allclose(out, ref, atol=5e-3, rtol=5e-3), "mismatch vs reference"

    print("KERNEL_OK")
</pallas_src>

<mosaic_0001>
module attributes {stable_mosaic.version = 11 : i64} {
  func.func @lstm_dir_kernel(%arg0: i32, %arg1: memref<1x8x8x32xf32, #tpu.memory_space<vmem>>, %arg2: memref<1x32x128xf32, #tpu.memory_space<vmem>>, %arg3: memref<1x32x128xf32, #tpu.memory_space<vmem>>, %arg4: memref<1x1x128xf32, #tpu.memory_space<vmem>>, %arg5: memref<1x8x8x32xf32, #tpu.memory_space<vmem>>) attributes {dimension_semantics = [#tpu.dimension_semantics<parallel>], iteration_bounds = array<i64: 2>, scalar_prefetch = 0 : i64, scratch_operands = 0 : i64, tpu.core_type = #tpu.core_type<tc>, window_params = [{transform_indices = @transform_0, window_bounds = array<i64: 1, 8, 8, 32>}, {transform_indices = @transform_1, window_bounds = array<i64: 1, 32, 128>}, {transform_indices = @transform_2, window_bounds = array<i64: 1, 32, 128>}, {transform_indices = @transform_3, window_bounds = array<i64: 1, 1, 128>}, {transform_indices = @transform_4, window_bounds = array<i64: 1, 8, 8, 32>}]} {
    %c0 = arith.constant 0 : index
    %c0_0 = arith.constant 0 : index
    %c0_1 = arith.constant 0 : index
    %0 = vector.load %arg2[%c0, %c0_0, %c0_1] : memref<1x32x128xf32, #tpu.memory_space<vmem>>, vector<1x32x128xf32>
    %1 = vector.shape_cast %0 : vector<1x32x128xf32> to vector<32x128xf32>
    %c0_2 = arith.constant 0 : index
    %c0_3 = arith.constant 0 : index
    %c0_4 = arith.constant 0 : index
    %2 = vector.load %arg3[%c0_2, %c0_3, %c0_4] : memref<1x32x128xf32, #tpu.memory_space<vmem>>, vector<1x32x128xf32>
    %3 = vector.shape_cast %2 : vector<1x32x128xf32> to vector<32x128xf32>
    %c0_5 = arith.constant 0 : index
    %c0_6 = arith.constant 0 : index
    %c0_7 = arith.constant 0 : index
    %4 = vector.load %arg4[%c0_5, %c0_6, %c0_7] : memref<1x1x128xf32, #tpu.memory_space<vmem>>, vector<1x1x128xf32>
    %5 = vector.shape_cast %4 : vector<1x1x128xf32> to vector<1x128xf32>
    %cst = arith.constant 0.000000e+00 : f32
    %6 = vector.broadcast %cst : f32 to vector<8x32xf32>
    %cst_8 = arith.constant 0.000000e+00 : f32
    %7 = vector.broadcast %cst_8 : f32 to vector<8x32xf32>
    %c0_9 = arith.constant 0 : index
    %c0_10 = arith.constant 0 : index
    %c0_11 = arith.constant 0 : index
    %c0_12 = arith.constant 0 : index
    %8 = vector.load %arg1[%c0_9, %c0_10, %c0_11, %c0_12] : memref<1x8x8x32xf32, #tpu.memory_space<vmem>>, vector<1x1x8x32xf32>
    %9 = vector.shape_cast %8 : vector<1x1x8x32xf32> to vector<8x32xf32>
    %cst_13 = arith.constant dense<0.000000e+00> : vector<8x128xf32>
    %10 = tpu.matmul %9, %1, %cst_13 {dimension_numbers = #tpu.dot_dimension_numbers<[1], [0], [0], [1], [0, 0, 1, 1], [], []>} : vector<8x32xf32>, vector<32x128xf32>, vector<8x128xf32> -> vector<8x128xf32>
    %cst_14 = arith.constant dense<0.000000e+00> : vector<8x128xf32>
    %11 = tpu.matmul %6, %3, %cst_14 {dimension_numbers = #tpu.dot_dimension_numbers<[1], [0], [0], [1], [0, 0, 1, 1], [], []>} : vector<8x32xf32>, vector<32x128xf32>, vector<8x128xf32> -> vector<8x128xf32>
    %12 = arith.addf %10, %11 : vector<8x128xf32>
    %13 = vector.broadcast %5 : vector<1x128xf32> to vector<8x128xf32>
    %14 = arith.addf %12, %13 : vector<8x128xf32>
    %15 = vector.extract_strided_slice %14 {offsets = [0, 0], sizes = [8, 32], strides = [1, 1]} : vector<8x128xf32> to vector<8x32xf32>
    %16 = arith.negf %15 : vector<8x32xf32>
    %17 = math.exp %16 : vector<8x32xf32>
    %cst_15 = arith.constant 1.000000e+00 : f32
    %18 = vector.broadcast %cst_15 : f32 to vector<8x32xf32>
    %19 = arith.addf %18, %17 : vector<8x32xf32>
    %20 = arith.divf %18, %19 : vector<8x32xf32>
    %21 = vector.extract_strided_slice %14 {offsets = [0, 32], sizes = [8, 32], strides = [1, 1]} : vector<8x128xf32> to vector<8x32xf32>
    %22 = arith.negf %21 : vector<8x32xf32>
    %23 = math.exp %22 : vector<8x32xf32>
    %cst_16 = arith.constant 1.000000e+00 : f32
    %24 = vector.broadcast %cst_16 : f32 to vector<8x32xf32>
    %25 = arith.addf %24, %23 : vector<8x32xf32>
    %26 = arith.divf %24, %25 : vector<8x32xf32>
    %27 = vector.extract_strided_slice %14 {offsets = [0, 64], sizes = [8, 32], strides = [1, 1]} : vector<8x128xf32> to vector<8x32xf32>
    %28 = math.tanh %27 : vector<8x32xf32>
    %29 = vector.extract_strided_slice %14 {offsets = [0, 96], sizes = [8, 32], strides = [1, 1]} : vector<8x128xf32> to vector<8x32xf32>
    %30 = arith.negf %29 : vector<8x32xf32>
    %31 = math.exp %30 : vector<8x32xf32>
    %cst_17 = arith.constant 1.000000e+00 : f32
    %32 = vector.broadcast %cst_17 : f32 to vector<8x32xf32>
    %33 = arith.addf %32, %31 : vector<8x32xf32>
    %34 = arith.divf %32, %33 : vector<8x32xf32>
    %35 = arith.mulf %26, %7 : vector<8x32xf32>
    %36 = arith.mulf %20, %28 : vector<8x32xf32>
    %37 = arith.addf %35, %36 : vector<8x32xf32>
    %38 = math.tanh %37 : vector<8x32xf32>
    %39 = arith.mulf %34, %38 : vector<8x32xf32>
    %c0_18 = arith.constant 0 : index
    %c0_19 = arith.constant 0 : index
    %c0_20 = arith.constant 0 : index
    %c0_21 = arith.constant 0 : index
    %40 = vector.load %arg5[%c0_18, %c0_19, %c0_20, %c0_21] : memref<1x8x8x32xf32, #tpu.memory_space<vmem>>, vector<1x1x8x32xf32>
    %41 = vector.shape_cast %40 : vector<1x1x8x32xf32> to vector<8x32xf32>
    %42 = vector.shape_cast %39 : vector<8x32xf32> to vector<1x1x8x32xf32>
    tpu.vector_store %arg5[%c0_18, %c0_19, %c0_20, %c0_21], %42 {strides = array<i32>} : memref<1x8x8x32xf32, #tpu.memory_space<vmem>>, vector<1x1x8x32xf32>,
    %c0_22 = arith.constant 0 : index
    %c1 = arith.constant 1 : index
    %c0_23 = arith.constant 0 : index
    %c0_24 = arith.constant 0 : index
    %43 = vector.load %arg1[%c0_22, %c1, %c0_23, %c0_24] : memref<1x8x8x32xf32, #tpu.memory_space<vmem>>, vector<1x1x8x32xf32>
    %44 = vector.shape_cast %43 : vector<1x1x8x32xf32> to vector<8x32xf32>
    %cst_25 = arith.constant dense<0.000000e+00> : vector<8x128xf32>
    %45 = tpu.matmul %44, %1, %cst_25 {dimension_numbers = #tpu.dot_dimension_numbers<[1], [0], [0], [1], [0, 0, 1, 1], [], []>} : vector<8x32xf32>, vector<32x128xf32>, vector<8x128xf32> -> vector<8x128xf32>
    %cst_26 = arith.constant dense<0.000000e+00> : vector<8x128xf32>
    %46 = tpu.matmul %39, %3, %cst_26 {dimension_numbers = #tpu.dot_dimension_numbers<[1], [0], [0], [1], [0, 0, 1, 1], [], []>} : vector<8x32xf32>, vector<32x128xf32>, vector<8x128xf32> -> vector<8x128xf32>
    %47 = arith.addf %45, %46 : vector<8x128xf32>
    %48 = vector.broadcast %5 : vector<1x128xf32> to vector<8x128xf32>
    %49 = arith.addf %47, %48 : vector<8x128xf32>
    %50 = vector.extract_strided_slice %49 {offsets = [0, 0], sizes = [8, 32], strides = [1, 1]} : vector<8x128xf32> to vector<8x32xf32>
    %51 = arith.negf %50 : vector<8x32xf32>
    %52 = math.exp %51 : vector<8x32xf32>
    %cst_27 = arith.constant 1.000000e+00 : f32
    %53 = vector.broadcast %cst_27 : f32 to vector<8x32xf32>
    %54 = arith.addf %53, %52 : vector<8x32xf32>
    %55 = arith.divf %53, %54 : vector<8x32xf32>
    %56 = vector.extract_strided_slice %49 {offsets = [0, 32], sizes = [8, 32], strides = [1, 1]} : vector<8x128xf32> to vector<8x32xf32>
    %57 = arith.negf %56 : vector<8x32xf32>
    %58 = math.exp %57 : vector<8x32xf32>
    %cst_28 = arith.constant 1.000000e+00 : f32
    %59 = vector.broadcast %cst_28 : f32 to vector<8x32xf32>
    %60 = arith.addf %59, %58 : vector<8x32xf32>
    %61 = arith.divf %59, %60 : vector<8x32xf32>
    %62 = vector.extract_strided_slice %49 {offsets = [0, 64], sizes = [8, 32], strides = [1, 1]} : vector<8x128xf32> to vector<8x32xf32>
    %63 = math.tanh %62 : vector<8x32xf32>
    %64 = vector.extract_strided_slice %49 {offsets = [0, 96], sizes = [8, 32], strides = [1, 1]} : vector<8x128xf32> to vector<8x32xf32>
    %65 = arith.negf %64 : vector<8x32xf32>
    %66 = math.exp %65 : vector<8x32xf32>
    %cst_29 = arith.constant 1.000000e+00 : f32
    %67 = vector.broadcast %cst_29 : f32 to vector<8x32xf32>
    %68 = arith.addf %67, %66 : vector<8x32xf32>
    %69 = arith.divf %67, %68 : vector<8x32xf32>
    %70 = arith.mulf %61, %37 : vector<8x32xf32>
    %71 = arith.mulf %55, %63 : vector<8x32xf32>
    %72 = arith.addf %70, %71 : vector<8x32xf32>
    %73 = math.tanh %72 : vector<8x32xf32>
    %74 = arith.mulf %69, %73 : vector<8x32xf32>
    %c0_30 = arith.constant 0 : index
    %c1_31 = arith.constant 1 : index
    %c0_32 = arith.constant 0 : index
    %c0_33 = arith.constant 0 : index
    %75 = vector.load %arg5[%c0_30, %c1_31, %c0_32, %c0_33] : memref<1x8x8x32xf32, #tpu.memory_space<vmem>>, vector<1x1x8x32xf32>
    %76 = vector.shape_cast %75 : vector<1x1x8x32xf32> to vector<8x32xf32>
    %77 = vector.shape_cast %74 : vector<8x32xf32> to vector<1x1x8x32xf32>
    tpu.vector_store %arg5[%c0_30, %c1_31, %c0_32, %c0_33], %77 {strides = array<i32>} : memref<1x8x8x32xf32, #tpu.memory_space<vmem>>, vector<1x1x8x32xf32>,
    %c0_34 = arith.constant 0 : index
    %c2 = arith.constant 2 : index
    %c0_35 = arith.constant 0 : index
    %c0_36 = arith.constant 0 : index
    %78 = vector.load %arg1[%c0_34, %c2, %c0_35, %c0_36] : memref<1x8x8x32xf32, #tpu.memory_space<vmem>>, vector<1x1x8x32xf32>
    %79 = vector.shape_cast %78 : vector<1x1x8x32xf32> to vector<8x32xf32>
    %cst_37 = arith.constant dense<0.000000e+00> : vector<8x128xf32>
    %80 = tpu.matmul %79, %1, %cst_37 {dimension_numbers = #tpu.dot_dimension_numbers<[1], [0], [0], [1], [0, 0, 1, 1], [], []>} : vector<8x32xf32>, vector<32x128xf32>, vector<8x128xf32> -> vector<8x128xf32>
    %cst_38 = arith.constant dense<0.000000e+00> : vector<8x128xf32>
    %81 = tpu.matmul %74, %3, %cst_38 {dimension_numbers = #tpu.dot_dimension_numbers<[1], [0], [0], [1], [0, 0, 1, 1], [], []>} : vector<8x32xf32>, vector<32x128xf32>, vector<8x128xf32> -> vector<8x128xf32>
    %82 = arith.addf %80, %81 : vector<8x128xf32>
    %83 = vector.broadcast %5 : vector<1x128xf32> to vector<8x128xf32>
    %84 = arith.addf %82, %83 : vector<8x128xf32>
    %85 = vector.extract_strided_slice %84 {offsets = [0, 0], sizes = [8, 32], strides = [1, 1]} : vector<8x128xf32> to vector<8x32xf32>
    %86 = arith.negf %85 : vector<8x32xf32>
    %87 = math.exp %86 : vector<8x32xf32>
    %cst_39 = arith.constant 1.000000e+00 : f32
    %88 = vector.broadcast %cst_39 : f32 to vector<8x32xf32>
    %89 = arith.addf %88, %87 : vector<8x32xf32>
    %90 = arith.divf %88, %89 : vector<8x32xf32>
    %91 = vector.extract_strided_slice %84 {offsets = [0, 32], sizes = [8, 32], strides = [1, 1]} : vector<8x128xf32> to vector<8x32xf32>
    %92 = arith.negf %91 : vector<8x32xf32>
    %93 = math.exp %92 : vector<8x32xf32>
    %cst_40 = arith.constant 1.000000e+00 : f32
    %94 = vector.broadcast %cst_40 : f32 to vector<8x32xf32>
    %95 = arith.addf %94, %93 : vector<8x32xf32>
    %96 = arith.divf %94, %95 : vector<8x32xf32>
    %97 = vector.extract_strided_slice %84 {offsets = [0, 64], sizes = [8, 32], strides = [1, 1]} : vector<8x128xf32> to vector<8x32xf32>
    %98 = math.tanh %97 : vector<8x32xf32>
    %99 = vector.extract_strided_slice %84 {offsets = [0, 96], sizes = [8, 32], strides = [1, 1]} : vector<8x128xf32> to vector<8x32xf32>
    %100 = arith.negf %99 : vector<8x32xf32>
    %101 = math.exp %100 : vector<8x32xf32>
    %cst_41 = arith.constant 1.000000e+00 : f32
    %102 = vector.broadcast %cst_41 : f32 to vector<8x32xf32>
    %103 = arith.addf %102, %101 : vector<8x32xf32>
    %104 = arith.divf %102, %103 : vector<8x32xf32>
    %105 = arith.mulf %96, %72 : vector<8x32xf32>
    %106 = arith.mulf %90, %98 : vector<8x32xf32>
    %107 = arith.addf %105, %106 : vector<8x32xf32>
    %108 = math.tanh %107 : vector<8x32xf32>
    %109 = arith.mulf %104, %108 : vector<8x32xf32>
    %c0_42 = arith.constant 0 : index
    %c2_43 = arith.constant 2 : index
    %c0_44 = arith.constant 0 : index
    %c0_45 = arith.constant 0 : index
    %110 = vector.load %arg5[%c0_42, %c2_43, %c0_44, %c0_45] : memref<1x8x8x32xf32, #tpu.memory_space<vmem>>, vector<1x1x8x32xf32>
    %111 = vector.shape_cast %110 : vector<1x1x8x32xf32> to vector<8x32xf32>
    %112 = vector.shape_cast %109 : vector<8x32xf32> to vector<1x1x8x32xf32>
    tpu.vector_store %arg5[%c0_42, %c2_43, %c0_44, %c0_45], %112 {strides = array<i32>} : memref<1x8x8x32xf32, #tpu.memory_space<vmem>>, vector<1x1x8x32xf32>,
    %c0_46 = arith.constant 0 : index
    %c3 = arith.constant 3 : index
    %c0_47 = arith.constant 0 : index
    %c0_48 = arith.constant 0 : index
    %113 = vector.load %arg1[%c0_46, %c3, %c0_47, %c0_48] : memref<1x8x8x32xf32, #tpu.memory_space<vmem>>, vector<1x1x8x32xf32>
    %114 = vector.shape_cast %113 : vector<1x1x8x32xf32> to vector<8x32xf32>
    %cst_49 = arith.constant dense<0.000000e+00> : vector<8x128xf32>
    %115 = tpu.matmul %114, %1, %cst_49 {dimension_numbers = #tpu.dot_dimension_numbers<[1], [0], [0], [1], [0, 0, 1, 1], [], []>} : vector<8x32xf32>, vector<32x128xf32>, vector<8x128xf32> -> vector<8x128xf32>
    %cst_50 = arith.constant dense<0.000000e+00> : vector<8x128xf32>
    %116 = tpu.matmul %109, %3, %cst_50 {dimension_numbers = #tpu.dot_dimension_numbers<[1], [0], [0], [1], [0, 0, 1, 1], [], []>} : vector<8x32xf32>, vector<32x128xf32>, vector<8x128xf32> -> vector<8x128xf32>
    %117 = arith.addf %115, %116 : vector<8x128xf32>
    %118 = vector.broadcast %5 : vector<1x128xf32> to vector<8x128xf32>
    %119 = arith.addf %117, %118 : vector<8x128xf32>
    %120 = vector.extract_strided_slice %119 {offsets = [0, 0], sizes = [8, 32], strides = [1, 1]} : vector<8x128xf32> to vector<8x32xf32>
    %121 = arith.negf %120 : vector<8x32xf32>
    %122 = math.exp %121 : vector<8x32xf32>
    %cst_51 = arith.constant 1.000000e+00 : f32
    %123 = vector.broadcast %cst_51 : f32 to vector<8x32xf32>
    %124 = arith.addf %123, %122 : vector<8x32xf32>
    %125 = arith.divf %123, %124 : vector<8x32xf32>
    %126 = vector.extract_strided_slice %119 {offsets = [0, 32], sizes = [8, 32], strides = [1, 1]} : vector<8x128xf32> to vector<8x32xf32>
    %127 = arith.negf %126 : vector<8x32xf32>
    %128 = math.exp %127 : vector<8x32xf32>
    %cst_52 = arith.constant 1.000000e+00 : f32
    %129 = vector.broadcast %cst_52 : f32 to vector<8x32xf32>
    %130 = arith.addf %129, %128 : vector<8x32xf32>
    %131 = arith.divf %129, %130 : vector<8x32xf32>
    %132 = vector.extract_strided_slice %119 {offsets = [0, 64], sizes = [8, 32], strides = [1, 1]} : vector<8x128xf32> to vector<8x32xf32>
    %133 = math.tanh %132 : vector<8x32xf32>
    %134 = vector.extract_strided_slice %119 {offsets = [0, 96], sizes = [8, 32], strides = [1, 1]} : vector<8x128xf32> to vector<8x32xf32>
    %135 = arith.negf %134 : vector<8x32xf32>
    %136 = math.exp %135 : vector<8x32xf32>
    %cst_53 = arith.constant 1.000000e+00 : f32
    %137 = vector.broadcast %cst_53 : f32 to vector<8x32xf32>
    %138 = arith.addf %137, %136 : vector<8x32xf32>
    %139 = arith.divf %137, %138 : vector<8x32xf32>
    %140 = arith.mulf %131, %107 : vector<8x32xf32>
    %141 = arith.mulf %125, %133 : vector<8x32xf32>
    %142 = arith.addf %140, %141 : vector<8x32xf32>
    %143 = math.tanh %142 : vector<8x32xf32>
    %144 = arith.mulf %139, %143 : vector<8x32xf32>
    %c0_54 = arith.constant 0 : index
    %c3_55 = arith.constant 3 : index
    %c0_56 = arith.constant 0 : index
    %c0_57 = arith.constant 0 : index
    %145 = vector.load %arg5[%c0_54, %c3_55, %c0_56, %c0_57] : memref<1x8x8x32xf32, #tpu.memory_space<vmem>>, vector<1x1x8x32xf32>
    %146 = vector.shape_cast %145 : vector<1x1x8x32xf32> to vector<8x32xf32>
    %147 = vector.shape_cast %144 : vector<8x32xf32> to vector<1x1x8x32xf32>
    tpu.vector_store %arg5[%c0_54, %c3_55, %c0_56, %c0_57], %147 {strides = array<i32>} : memref<1x8x8x32xf32, #tpu.memory_space<vmem>>, vector<1x1x8x32xf32>,
    %c0_58 = arith.constant 0 : index
    %c4 = arith.constant 4 : index
    %c0_59 = arith.constant 0 : index
    %c0_60 = arith.constant 0 : index
    %148 = vector.load %arg1[%c0_58, %c4, %c0_59, %c0_60] : memref<1x8x8x32xf32, #tpu.memory_space<vmem>>, vector<1x1x8x32xf32>
    %149 = vector.shape_cast %148 : vector<1x1x8x32xf32> to vector<8x32xf32>
    %cst_61 = arith.constant dense<0.000000e+00> : vector<8x128xf32>
    %150 = tpu.matmul %149, %1, %cst_61 {dimension_numbers = #tpu.dot_dimension_numbers<[1], [0], [0], [1], [0, 0, 1, 1], [], []>} : vector<8x32xf32>, vector<32x128xf32>, vector<8x128xf32> -> vector<8x128xf32>
    %cst_62 = arith.constant dense<0.000000e+00> : vector<8x128xf32>
    %151 = tpu.matmul %144, %3, %cst_62 {dimension_numbers = #tpu.dot_dimension_numbers<[1], [0], [0], [1], [0, 0, 1, 1], [], []>} : vector<8x32xf32>, vector<32x128xf32>, vector<8x128xf32> -> vector<8x128xf32>
    %152 = arith.addf %150, %151 : vector<8x128xf32>
    %153 = vector.broadcast %5 : vector<1x128xf32> to vector<8x128xf32>
    %154 = arith.addf %152, %153 : vector<8x128xf32>
    %155 = vector.extract_strided_slice %154 {offsets = [0, 0], sizes = [8, 32], strides = [1, 1]} : vector<8x128xf32> to vector<8x32xf32>
    %156 = arith.negf %155 : vector<8x32xf32>
    %157 = math.exp %156 : vector<8x32xf32>
    %cst_63 = arith.constant 1.000000e+00 : f32
    %158 = vector.broadcast %cst_63 : f32 to vector<8x32xf32>
    %159 = arith.addf %158, %157 : vector<8x32xf32>
    %160 = arith.divf %158, %159 : vector<8x32xf32>
    %161 = vector.extract_strided_slice %154 {offsets = [0, 32], sizes = [8, 32], strides = [1, 1]} : vector<8x128xf32> to vector<8x32xf32>
    %162 = arith.negf %161 : vector<8x32xf32>
    %163 = math.exp %162 : vector<8x32xf32>
    %cst_64 = arith.constant 1.000000e+00 : f32
    %164 = vector.broadcast %cst_64 : f32 to vector<8x32xf32>
    %165 = arith.addf %164, %163 : vector<8x32xf32>
    %166 = arith.divf %164, %165 : vector<8x32xf32>
    %167 = vector.extract_strided_slice %154 {offsets = [0, 64], sizes = [8, 32], strides = [1, 1]} : vector<8x128xf32> to vector<8x32xf32>
    %168 = math.tanh %167 : vector<8x32xf32>
    %169 = vector.extract_strided_slice %154 {offsets = [0, 96], sizes = [8, 32], strides = [1, 1]} : vector<8x128xf32> to vector<8x32xf32>
    %170 = arith.negf %169 : vector<8x32xf32>
    %171 = math.exp %170 : vector<8x32xf32>
    %cst_65 = arith.constant 1.000000e+00 : f32
    %172 = vector.broadcast %cst_65 : f32 to vector<8x32xf32>
    %173 = arith.addf %172, %171 : vector<8x32xf32>
    %174 = arith.divf %172, %173 : vector<8x32xf32>
    %175 = arith.mulf %166, %142 : vector<8x32xf32>
    %176 = arith.mulf %160, %168 : vector<8x32xf32>
    %177 = arith.addf %175, %176 : vector<8x32xf32>
    %178 = math.tanh %177 : vector<8x32xf32>
    %179 = arith.mulf %174, %178 : vector<8x32xf32>
    %c0_66 = arith.constant 0 : index
    %c4_67 = arith.constant 4 : index
    %c0_68 = arith.constant 0 : index
    %c0_69 = arith.constant 0 : index
    %180 = vector.load %arg5[%c0_66, %c4_67, %c0_68, %c0_69] : memref<1x8x8x32xf32, #tpu.memory_space<vmem>>, vector<1x1x8x32xf32>
    %181 = vector.shape_cast %180 : vector<1x1x8x32xf32> to vector<8x32xf32>
    %182 = vector.shape_cast %179 : vector<8x32xf32> to vector<1x1x8x32xf32>
    tpu.vector_store %arg5[%c0_66, %c4_67, %c0_68, %c0_69], %182 {strides = array<i32>} : memref<1x8x8x32xf32, #tpu.memory_space<vmem>>, vector<1x1x8x32xf32>,
    %c0_70 = arith.constant 0 : index
    %c5 = arith.constant 5 : index
    %c0_71 = arith.constant 0 : index
    %c0_72 = arith.constant 0 : index
    %183 = vector.load %arg1[%c0_70, %c5, %c0_71, %c0_72] : memref<1x8x8x32xf32, #tpu.memory_space<vmem>>, vector<1x1x8x32xf32>
    %184 = vector.shape_cast %183 : vector<1x1x8x32xf32> to vector<8x32xf32>
    %cst_73 = arith.constant dense<0.000000e+00> : vector<8x128xf32>
    %185 = tpu.matmul %184, %1, %cst_73 {dimension_numbers = #tpu.dot_dimension_numbers<[1], [0], [0], [1], [0, 0, 1, 1], [], []>} : vector<8x32xf32>, vector<32x128xf32>, vector<8x128xf32> -> vector<8x128xf32>
    %cst_74 = arith.constant dense<0.000000e+00> : vector<8x128xf32>
    %186 = tpu.matmul %179, %3, %cst_74 {dimension_numbers = #tpu.dot_dimension_numbers<[1], [0], [0], [1], [0, 0, 1, 1], [], []>} : vector<8x32xf32>, vector<32x128xf32>, vector<8x128xf32> -> vector<8x128xf32>
    %187 = arith.addf %185, %186 : vector<8x128xf32>
    %188 = vector.broadcast %5 : vector<1x128xf32> to vector<8x128xf32>
    %189 = arith.addf %187, %188 : vector<8x128xf32>
    %190 = vector.extract_strided_slice %189 {offsets = [0, 0], sizes = [8, 32], strides = [1, 1]} : vector<8x128xf32> to vector<8x32xf32>
    %191 = arith.negf %190 : vector<8x32xf32>
    %192 = math.exp %191 : vector<8x32xf32>
    %cst_75 = arith.constant 1.000000e+00 : f32
    %193 = vector.broadcast %cst_75 : f32 to vector<8x32xf32>
    %194 = arith.addf %193, %192 : vector<8x32xf32>
    %195 = arith.divf %193, %194 : vector<8x32xf32>
    %196 = vector.extract_strided_slice %189 {offsets = [0, 32], sizes = [8, 32], strides = [1, 1]} : vector<8x128xf32> to vector<8x32xf32>
    %197 = arith.negf %196 : vector<8x32xf32>
    %198 = math.exp %197 : vector<8x32xf32>
    %cst_76 = arith.constant 1.000000e+00 : f32
    %199 = vector.broadcast %cst_76 : f32 to vector<8x32xf32>
    %200 = arith.addf %199, %198 : vector<8x32xf32>
    %201 = arith.divf %199, %200 : vector<8x32xf32>
    %202 = vector.extract_strided_slice %189 {offsets = [0, 64], sizes = [8, 32], strides = [1, 1]} : vector<8x128xf32> to vector<8x32xf32>
    %203 = math.tanh %202 : vector<8x32xf32>
    %204 = vector.extract_strided_slice %189 {offsets = [0, 96], sizes = [8, 32], strides = [1, 1]} : vector<8x128xf32> to vector<8x32xf32>
    %205 = arith.negf %204 : vector<8x32xf32>
    %206 = math.exp %205 : vector<8x32xf32>
    %cst_77 = arith.constant 1.000000e+00 : f32
    %207 = vector.broadcast %cst_77 : f32 to vector<8x32xf32>
    %208 = arith.addf %207, %206 : vector<8x32xf32>
    %209 = arith.divf %207, %208 : vector<8x32xf32>
    %210 = arith.mulf %201, %177 : vector<8x32xf32>
    %211 = arith.mulf %195, %203 : vector<8x32xf32>
    %212 = arith.addf %210, %211 : vector<8x32xf32>
    %213 = math.tanh %212 : vector<8x32xf32>
    %214 = arith.mulf %209, %213 : vector<8x32xf32>
    %c0_78 = arith.constant 0 : index
    %c5_79 = arith.constant 5 : index
    %c0_80 = arith.constant 0 : index
    %c0_81 = arith.constant 0 : index
    %215 = vector.load %arg5[%c0_78, %c5_79, %c0_80, %c0_81] : memref<1x8x8x32xf32, #tpu.memory_space<vmem>>, vector<1x1x8x32xf32>
    %216 = vector.shape_cast %215 : vector<1x1x8x32xf32> to vector<8x32xf32>
    %217 = vector.shape_cast %214 : vector<8x32xf32> to vector<1x1x8x32xf32>
    tpu.vector_store %arg5[%c0_78, %c5_79, %c0_80, %c0_81], %217 {strides = array<i32>} : memref<1x8x8x32xf32, #tpu.memory_space<vmem>>, vector<1x1x8x32xf32>,
    %c0_82 = arith.constant 0 : index
    %c6 = arith.constant 6 : index
    %c0_83 = arith.constant 0 : index
    %c0_84 = arith.constant 0 : index
    %218 = vector.load %arg1[%c0_82, %c6, %c0_83, %c0_84] : memref<1x8x8x32xf32, #tpu.memory_space<vmem>>, vector<1x1x8x32xf32>
    %219 = vector.shape_cast %218 : vector<1x1x8x32xf32> to vector<8x32xf32>
    %cst_85 = arith.constant dense<0.000000e+00> : vector<8x128xf32>
    %220 = tpu.matmul %219, %1, %cst_85 {dimension_numbers = #tpu.dot_dimension_numbers<[1], [0], [0], [1], [0, 0, 1, 1], [], []>} : vector<8x32xf32>, vector<32x128xf32>, vector<8x128xf32> -> vector<8x128xf32>
    %cst_86 = arith.constant dense<0.000000e+00> : vector<8x128xf32>
    %221 = tpu.matmul %214, %3, %cst_86 {dimension_numbers = #tpu.dot_dimension_numbers<[1], [0], [0], [1], [0, 0, 1, 1], [], []>} : vector<8x32xf32>, vector<32x128xf32>, vector<8x128xf32> -> vector<8x128xf32>
    %222 = arith.addf %220, %221 : vector<8x128xf32>
    %223 = vector.broadcast %5 : vector<1x128xf32> to vector<8x128xf32>
    %224 = arith.addf %222, %223 : vector<8x128xf32>
    %225 = vector.extract_strided_slice %224 {offsets = [0, 0], sizes = [8, 32], strides = [1, 1]} : vector<8x128xf32> to vector<8x32xf32>
    %226 = arith.negf %225 : vector<8x32xf32>
    %227 = math.exp %226 : vector<8x32xf32>
    %cst_87 = arith.constant 1.000000e+00 : f32
    %228 = vector.broadcast %cst_87 : f32 to vector<8x32xf32>
    %229 = arith.addf %228, %227 : vector<8x32xf32>
    %230 = arith.divf %228, %229 : vector<8x32xf32>
    %231 = vector.extract_strided_slice %224 {offsets = [0, 32], sizes = [8, 32], strides = [1, 1]} : vector<8x128xf32> to vector<8x32xf32>
    %232 = arith.negf %231 : vector<8x32xf32>
    %233 = math.exp %232 : vector<8x32xf32>
    %cst_88 = arith.constant 1.000000e+00 : f32
    %234 = vector.broadcast %cst_88 : f32 to vector<8x32xf32>
    %235 = arith.addf %234, %233 : vector<8x32xf32>
    %236 = arith.divf %234, %235 : vector<8x32xf32>
    %237 = vector.extract_strided_slice %224 {offsets = [0, 64], sizes = [8, 32], strides = [1, 1]} : vector<8x128xf32> to vector<8x32xf32>
    %238 = math.tanh %237 : vector<8x32xf32>
    %239 = vector.extract_strided_slice %224 {offsets = [0, 96], sizes = [8, 32], strides = [1, 1]} : vector<8x128xf32> to vector<8x32xf32>
    %240 = arith.negf %239 : vector<8x32xf32>
    %241 = math.exp %240 : vector<8x32xf32>
    %cst_89 = arith.constant 1.000000e+00 : f32
    %242 = vector.broadcast %cst_89 : f32 to vector<8x32xf32>
    %243 = arith.addf %242, %241 : vector<8x32xf32>
    %244 = arith.divf %242, %243 : vector<8x32xf32>
    %245 = arith.mulf %236, %212 : vector<8x32xf32>
    %246 = arith.mulf %230, %238 : vector<8x32xf32>
    %247 = arith.addf %245, %246 : vector<8x32xf32>
    %248 = math.tanh %247 : vector<8x32xf32>
    %249 = arith.mulf %244, %248 : vector<8x32xf32>
    %c0_90 = arith.constant 0 : index
    %c6_91 = arith.constant 6 : index
    %c0_92 = arith.constant 0 : index
    %c0_93 = arith.constant 0 : index
    %250 = vector.load %arg5[%c0_90, %c6_91, %c0_92, %c0_93] : memref<1x8x8x32xf32, #tpu.memory_space<vmem>>, vector<1x1x8x32xf32>
    %251 = vector.shape_cast %250 : vector<1x1x8x32xf32> to vector<8x32xf32>
    %252 = vector.shape_cast %249 : vector<8x32xf32> to vector<1x1x8x32xf32>
    tpu.vector_store %arg5[%c0_90, %c6_91, %c0_92, %c0_93], %252 {strides = array<i32>} : memref<1x8x8x32xf32, #tpu.memory_space<vmem>>, vector<1x1x8x32xf32>,
    %c0_94 = arith.constant 0 : index
    %c7 = arith.constant 7 : index
    %c0_95 = arith.constant 0 : index
    %c0_96 = arith.constant 0 : index
    %253 = vector.load %arg1[%c0_94, %c7, %c0_95, %c0_96] : memref<1x8x8x32xf32, #tpu.memory_space<vmem>>, vector<1x1x8x32xf32>
    %254 = vector.shape_cast %253 : vector<1x1x8x32xf32> to vector<8x32xf32>
    %cst_97 = arith.constant dense<0.000000e+00> : vector<8x128xf32>
    %255 = tpu.matmul %254, %1, %cst_97 {dimension_numbers = #tpu.dot_dimension_numbers<[1], [0], [0], [1], [0, 0, 1, 1], [], []>} : vector<8x32xf32>, vector<32x128xf32>, vector<8x128xf32> -> vector<8x128xf32>
    %cst_98 = arith.constant dense<0.000000e+00> : vector<8x128xf32>
    %256 = tpu.matmul %249, %3, %cst_98 {dimension_numbers = #tpu.dot_dimension_numbers<[1], [0], [0], [1], [0, 0, 1, 1], [], []>} : vector<8x32xf32>, vector<32x128xf32>, vector<8x128xf32> -> vector<8x128xf32>
    %257 = arith.addf %255, %256 : vector<8x128xf32>
    %258 = vector.broadcast %5 : vector<1x128xf32> to vector<8x128xf32>
    %259 = arith.addf %257, %258 : vector<8x128xf32>
    %260 = vector.extract_strided_slice %259 {offsets = [0, 0], sizes = [8, 32], strides = [1, 1]} : vector<8x128xf32> to vector<8x32xf32>
    %261 = arith.negf %260 : vector<8x32xf32>
    %262 = math.exp %261 : vector<8x32xf32>
    %cst_99 = arith.constant 1.000000e+00 : f32
    %263 = vector.broadcast %cst_99 : f32 to vector<8x32xf32>
    %264 = arith.addf %263, %262 : vector<8x32xf32>
    %265 = arith.divf %263, %264 : vector<8x32xf32>
    %266 = vector.extract_strided_slice %259 {offsets = [0, 32], sizes = [8, 32], strides = [1, 1]} : vector<8x128xf32> to vector<8x32xf32>
    %267 = arith.negf %266 : vector<8x32xf32>
    %268 = math.exp %267 : vector<8x32xf32>
    %cst_100 = arith.constant 1.000000e+00 : f32
    %269 = vector.broadcast %cst_100 : f32 to vector<8x32xf32>
    %270 = arith.addf %269, %268 : vector<8x32xf32>
    %271 = arith.divf %269, %270 : vector<8x32xf32>
    %272 = vector.extract_strided_slice %259 {offsets = [0, 64], sizes = [8, 32], strides = [1, 1]} : vector<8x128xf32> to vector<8x32xf32>
    %273 = math.tanh %272 : vector<8x32xf32>
    %274 = vector.extract_strided_slice %259 {offsets = [0, 96], sizes = [8, 32], strides = [1, 1]} : vector<8x128xf32> to vector<8x32xf32>
    %275 = arith.negf %274 : vector<8x32xf32>
    %276 = math.exp %275 : vector<8x32xf32>
    %cst_101 = arith.constant 1.000000e+00 : f32
    %277 = vector.broadcast %cst_101 : f32 to vector<8x32xf32>
    %278 = arith.addf %277, %276 : vector<8x32xf32>
    %279 = arith.divf %277, %278 : vector<8x32xf32>
    %280 = arith.mulf %271, %247 : vector<8x32xf32>
    %281 = arith.mulf %265, %273 : vector<8x32xf32>
    %282 = arith.addf %280, %281 : vector<8x32xf32>
    %283 = math.tanh %282 : vector<8x32xf32>
    %284 = arith.mulf %279, %283 : vector<8x32xf32>
    %c0_102 = arith.constant 0 : index
    %c7_103 = arith.constant 7 : index
    %c0_104 = arith.constant 0 : index
    %c0_105 = arith.constant 0 : index
    %285 = vector.load %arg5[%c0_102, %c7_103, %c0_104, %c0_105] : memref<1x8x8x32xf32, #tpu.memory_space<vmem>>, vector<1x1x8x32xf32>
    %286 = vector.shape_cast %285 : vector<1x1x8x32xf32> to vector<8x32xf32>
    %287 = vector.shape_cast %284 : vector<8x32xf32> to vector<1x1x8x32xf32>
    tpu.vector_store %arg5[%c0_102, %c7_103, %c0_104, %c0_105], %287 {strides = array<i32>} : memref<1x8x8x32xf32, #tpu.memory_space<vmem>>, vector<1x1x8x32xf32>,
    return
  }
  func.func @transform_0(%arg0: i32) -> (i32, i32, i32, i32) {
    %c0_i32 = arith.constant 0 : i32
    %c0_i32_0 = arith.constant 0 : i32
    %c0_i32_1 = arith.constant 0 : i32
    %c0_i32_2 = arith.constant 0 : i32
    return %arg0, %c0_i32, %c0_i32_0, %c0_i32_1 : i32, i32, i32, i32
  }
  func.func @transform_1(%arg0: i32) -> (i32, i32, i32) {
    %c0_i32 = arith.constant 0 : i32
    %c0_i32_0 = arith.constant 0 : i32
    %c0_i32_1 = arith.constant 0 : i32
    return %arg0, %c0_i32, %c0_i32_0 : i32, i32, i32
  }
  func.func @transform_2(%arg0: i32) -> (i32, i32, i32) {
    %c0_i32 = arith.constant 0 : i32
    %c0_i32_0 = arith.constant 0 : i32
    %c0_i32_1 = arith.constant 0 : i32
    return %arg0, %c0_i32, %c0_i32_0 : i32, i32, i32
  }
  func.func @transform_3(%arg0: i32) -> (i32, i32, i32) {
    %c0_i32 = arith.constant 0 : i32
    %c0_i32_0 = arith.constant 0 : i32
    %c0_i32_1 = arith.constant 0 : i32
    return %arg0, %c0_i32, %c0_i32_0 : i32, i32, i32
  }
  func.func @transform_4(%arg0: i32) -> (i32, i32, i32, i32) {
    %c0_i32 = arith.constant 0 : i32
    %c0_i32_0 = arith.constant 0 : i32
    %c0_i32_1 = arith.constant 0 : i32
    %c0_i32_2 = arith.constant 0 : i32
    return %arg0, %c0_i32, %c0_i32_0, %c0_i32_1 : i32, i32, i32, i32
  }
}

module attributes {stable_mosaic.version = 11 : i64} {
  func.func @linear_head_kernel(%arg0: memref<8x64xf32, #tpu.memory_space<vmem>>, %arg1: memref<1x64xf32, #tpu.memory_space<vmem>>, %arg2: memref<1x1xf32, #tpu.memory_space<smem>>, %arg3: memref<8x1xf32, #tpu.memory_space<vmem>>) attributes {dimension_semantics = [], scalar_prefetch = 0 : i64, scratch_operands = 0 : i64, tpu.core_type = #tpu.core_type<tc>} {
    %c0 = arith.constant 0 : index
    %c0_0 = arith.constant 0 : index
    %0 = vector.load %arg0[%c0, %c0_0] : memref<8x64xf32, #tpu.memory_space<vmem>>, vector<8x64xf32>
    %c0_1 = arith.constant 0 : index
    %c0_2 = arith.constant 0 : index
    %1 = vector.load %arg1[%c0_1, %c0_2] : memref<1x64xf32, #tpu.memory_space<vmem>>, vector<1x64xf32>
    %2 = vector.broadcast %1 : vector<1x64xf32> to vector<8x64xf32>
    %3 = arith.mulf %0, %2 : vector<8x64xf32>
    %cst = arith.constant dense<0.000000e+00> : vector<8xf32>
    %4 = vector.multi_reduction <add>, %3, %cst [1] : vector<8x64xf32> to vector<8xf32>
    %5 = vector.shape_cast %4 : vector<8xf32> to vector<8x1xf32>
    %c0_3 = arith.constant 0 : index
    %c0_4 = arith.constant 0 : index
    %6 = memref.load %arg2[%c0_3, %c0_4] : memref<1x1xf32, #tpu.memory_space<smem>>
    %7 = vector.broadcast %6 : f32 to vector<8x1xf32>
    %8 = arith.addf %5, %7 : vector<8x1xf32>
    %c0_5 = arith.constant 0 : index
    %c0_6 = arith.constant 0 : index
    %9 = vector.load %arg3[%c0_5, %c0_6] : memref<8x1xf32, #tpu.memory_space<vmem>>, vector<8x1xf32>
    tpu.vector_store %arg3[%c0_5, %c0_6], %8 {strides = array<i32>} : memref<8x1xf32, #tpu.memory_space<vmem>>, vector<8x1xf32>,
    return
  }
}

module attributes {stable_mosaic.version = 11 : i64} {
  func.func @lstm_dir_kernel(%arg0: i32, %arg1: memref<1x8x8x64xf32, #tpu.memory_space<vmem>>, %arg2: memref<1x64x128xf32, #tpu.memory_space<vmem>>, %arg3: memref<1x32x128xf32, #tpu.memory_space<vmem>>, %arg4: memref<1x1x128xf32, #tpu.memory_space<vmem>>, %arg5: memref<1x8x8x32xf32, #tpu.memory_space<vmem>>) attributes {dimension_semantics = [#tpu.dimension_semantics<parallel>], iteration_bounds = array<i64: 2>, scalar_prefetch = 0 : i64, scratch_operands = 0 : i64, tpu.core_type = #tpu.core_type<tc>, window_params = [{transform_indices = @transform_0, window_bounds = array<i64: 1, 8, 8, 64>}, {transform_indices = @transform_1, window_bounds = array<i64: 1, 64, 128>}, {transform_indices = @transform_2, window_bounds = array<i64: 1, 32, 128>}, {transform_indices = @transform_3, window_bounds = array<i64: 1, 1, 128>}, {transform_indices = @transform_4, window_bounds = array<i64: 1, 8, 8, 32>}]} {
    %c0 = arith.constant 0 : index
    %c0_0 = arith.constant 0 : index
    %c0_1 = arith.constant 0 : index
    %0 = vector.load %arg2[%c0, %c0_0, %c0_1] : memref<1x64x128xf32, #tpu.memory_space<vmem>>, vector<1x64x128xf32>
    %1 = vector.shape_cast %0 : vector<1x64x128xf32> to vector<64x128xf32>
    %c0_2 = arith.constant 0 : index
    %c0_3 = arith.constant 0 : index
    %c0_4 = arith.constant 0 : index
    %2 = vector.load %arg3[%c0_2, %c0_3, %c0_4] : memref<1x32x128xf32, #tpu.memory_space<vmem>>, vector<1x32x128xf32>
    %3 = vector.shape_cast %2 : vector<1x32x128xf32> to vector<32x128xf32>
    %c0_5 = arith.constant 0 : index
    %c0_6 = arith.constant 0 : index
    %c0_7 = arith.constant 0 : index
    %4 = vector.load %arg4[%c0_5, %c0_6, %c0_7] : memref<1x1x128xf32, #tpu.memory_space<vmem>>, vector<1x1x128xf32>
    %5 = vector.shape_cast %4 : vector<1x1x128xf32> to vector<1x128xf32>
    %cst = arith.constant 0.000000e+00 : f32
    %6 = vector.broadcast %cst : f32 to vector<8x32xf32>
    %cst_8 = arith.constant 0.000000e+00 : f32
    %7 = vector.broadcast %cst_8 : f32 to vector<8x32xf32>
    %c0_9 = arith.constant 0 : index
    %c0_10 = arith.constant 0 : index
    %c0_11 = arith.constant 0 : index
    %c0_12 = arith.constant 0 : index
    %8 = vector.load %arg1[%c0_9, %c0_10, %c0_11, %c0_12] : memref<1x8x8x64xf32, #tpu.memory_space<vmem>>, vector<1x1x8x64xf32>
    %9 = vector.shape_cast %8 : vector<1x1x8x64xf32> to vector<8x64xf32>
    %cst_13 = arith.constant dense<0.000000e+00> : vector<8x128xf32>
    %10 = tpu.matmul %9, %1, %cst_13 {dimension_numbers = #tpu.dot_dimension_numbers<[1], [0], [0], [1], [0, 0, 1, 1], [], []>} : vector<8x64xf32>, vector<64x128xf32>, vector<8x128xf32> -> vector<8x128xf32>
    %cst_14 = arith.constant dense<0.000000e+00> : vector<8x128xf32>
    %11 = tpu.matmul %6, %3, %cst_14 {dimension_numbers = #tpu.dot_dimension_numbers<[1], [0], [0], [1], [0, 0, 1, 1], [], []>} : vector<8x32xf32>, vector<32x128xf32>, vector<8x128xf32> -> vector<8x128xf32>
    %12 = arith.addf %10, %11 : vector<8x128xf32>
    %13 = vector.broadcast %5 : vector<1x128xf32> to vector<8x128xf32>
    %14 = arith.addf %12, %13 : vector<8x128xf32>
    %15 = vector.extract_strided_slice %14 {offsets = [0, 0], sizes = [8, 32], strides = [1, 1]} : vector<8x128xf32> to vector<8x32xf32>
    %16 = arith.negf %15 : vector<8x32xf32>
    %17 = math.exp %16 : vector<8x32xf32>
    %cst_15 = arith.constant 1.000000e+00 : f32
    %18 = vector.broadcast %cst_15 : f32 to vector<8x32xf32>
    %19 = arith.addf %18, %17 : vector<8x32xf32>
    %20 = arith.divf %18, %19 : vector<8x32xf32>
    %21 = vector.extract_strided_slice %14 {offsets = [0, 32], sizes = [8, 32], strides = [1, 1]} : vector<8x128xf32> to vector<8x32xf32>
    %22 = arith.negf %21 : vector<8x32xf32>
    %23 = math.exp %22 : vector<8x32xf32>
    %cst_16 = arith.constant 1.000000e+00 : f32
    %24 = vector.broadcast %cst_16 : f32 to vector<8x32xf32>
    %25 = arith.addf %24, %23 : vector<8x32xf32>
    %26 = arith.divf %24, %25 : vector<8x32xf32>
    %27 = vector.extract_strided_slice %14 {offsets = [0, 64], sizes = [8, 32], strides = [1, 1]} : vector<8x128xf32> to vector<8x32xf32>
    %28 = math.tanh %27 : vector<8x32xf32>
    %29 = vector.extract_strided_slice %14 {offsets = [0, 96], sizes = [8, 32], strides = [1, 1]} : vector<8x128xf32> to vector<8x32xf32>
    %30 = arith.negf %29 : vector<8x32xf32>
    %31 = math.exp %30 : vector<8x32xf32>
    %cst_17 = arith.constant 1.000000e+00 : f32
    %32 = vector.broadcast %cst_17 : f32 to vector<8x32xf32>
    %33 = arith.addf %32, %31 : vector<8x32xf32>
    %34 = arith.divf %32, %33 : vector<8x32xf32>
    %35 = arith.mulf %26, %7 : vector<8x32xf32>
    %36 = arith.mulf %20, %28 : vector<8x32xf32>
    %37 = arith.addf %35, %36 : vector<8x32xf32>
    %38 = math.tanh %37 : vector<8x32xf32>
    %39 = arith.mulf %34, %38 : vector<8x32xf32>
    %c0_18 = arith.constant 0 : index
    %c0_19 = arith.constant 0 : index
    %c0_20 = arith.constant 0 : index
    %c0_21 = arith.constant 0 : index
    %40 = vector.load %arg5[%c0_18, %c0_19, %c0_20, %c0_21] : memref<1x8x8x32xf32, #tpu.memory_space<vmem>>, vector<1x1x8x32xf32>
    %41 = vector.shape_cast %40 : vector<1x1x8x32xf32> to vector<8x32xf32>
    %42 = vector.shape_cast %39 : vector<8x32xf32> to vector<1x1x8x32xf32>
    tpu.vector_store %arg5[%c0_18, %c0_19, %c0_20, %c0_21], %42 {strides = array<i32>} : memref<1x8x8x32xf32, #tpu.memory_space<vmem>>, vector<1x1x8x32xf32>,
    %c0_22 = arith.constant 0 : index
    %c1 = arith.constant 1 : index
    %c0_23 = arith.constant 0 : index
    %c0_24 = arith.constant 0 : index
    %43 = vector.load %arg1[%c0_22, %c1, %c0_23, %c0_24] : memref<1x8x8x64xf32, #tpu.memory_space<vmem>>, vector<1x1x8x64xf32>
    %44 = vector.shape_cast %43 : vector<1x1x8x64xf32> to vector<8x64xf32>
    %cst_25 = arith.constant dense<0.000000e+00> : vector<8x128xf32>
    %45 = tpu.matmul %44, %1, %cst_25 {dimension_numbers = #tpu.dot_dimension_numbers<[1], [0], [0], [1], [0, 0, 1, 1], [], []>} : vector<8x64xf32>, vector<64x128xf32>, vector<8x128xf32> -> vector<8x128xf32>
    %cst_26 = arith.constant dense<0.000000e+00> : vector<8x128xf32>
    %46 = tpu.matmul %39, %3, %cst_26 {dimension_numbers = #tpu.dot_dimension_numbers<[1], [0], [0], [1], [0, 0, 1, 1], [], []>} : vector<8x32xf32>, vector<32x128xf32>, vector<8x128xf32> -> vector<8x128xf32>
    %47 = arith.addf %45, %46 : vector<8x128xf32>
    %48 = vector.broadcast %5 : vector<1x128xf32> to vector<8x128xf32>
    %49 = arith.addf %47, %48 : vector<8x128xf32>
    %50 = vector.extract_strided_slice %49 {offsets = [0, 0], sizes = [8, 32], strides = [1, 1]} : vector<8x128xf32> to vector<8x32xf32>
    %51 = arith.negf %50 : vector<8x32xf32>
    %52 = math.exp %51 : vector<8x32xf32>
    %cst_27 = arith.constant 1.000000e+00 : f32
    %53 = vector.broadcast %cst_27 : f32 to vector<8x32xf32>
    %54 = arith.addf %53, %52 : vector<8x32xf32>
    %55 = arith.divf %53, %54 : vector<8x32xf32>
    %56 = vector.extract_strided_slice %49 {offsets = [0, 32], sizes = [8, 32], strides = [1, 1]} : vector<8x128xf32> to vector<8x32xf32>
    %57 = arith.negf %56 : vector<8x32xf32>
    %58 = math.exp %57 : vector<8x32xf32>
    %cst_28 = arith.constant 1.000000e+00 : f32
    %59 = vector.broadcast %cst_28 : f32 to vector<8x32xf32>
    %60 = arith.addf %59, %58 : vector<8x32xf32>
    %61 = arith.divf %59, %60 : vector<8x32xf32>
    %62 = vector.extract_strided_slice %49 {offsets = [0, 64], sizes = [8, 32], strides = [1, 1]} : vector<8x128xf32> to vector<8x32xf32>
    %63 = math.tanh %62 : vector<8x32xf32>
    %64 = vector.extract_strided_slice %49 {offsets = [0, 96], sizes = [8, 32], strides = [1, 1]} : vector<8x128xf32> to vector<8x32xf32>
    %65 = arith.negf %64 : vector<8x32xf32>
    %66 = math.exp %65 : vector<8x32xf32>
    %cst_29 = arith.constant 1.000000e+00 : f32
    %67 = vector.broadcast %cst_29 : f32 to vector<8x32xf32>
    %68 = arith.addf %67, %66 : vector<8x32xf32>
    %69 = arith.divf %67, %68 : vector<8x32xf32>
    %70 = arith.mulf %61, %37 : vector<8x32xf32>
    %71 = arith.mulf %55, %63 : vector<8x32xf32>
    %72 = arith.addf %70, %71 : vector<8x32xf32>
    %73 = math.tanh %72 : vector<8x32xf32>
    %74 = arith.mulf %69, %73 : vector<8x32xf32>
    %c0_30 = arith.constant 0 : index
    %c1_31 = arith.constant 1 : index
    %c0_32 = arith.constant 0 : index
    %c0_33 = arith.constant 0 : index
    %75 = vector.load %arg5[%c0_30, %c1_31, %c0_32, %c0_33] : memref<1x8x8x32xf32, #tpu.memory_space<vmem>>, vector<1x1x8x32xf32>
    %76 = vector.shape_cast %75 : vector<1x1x8x32xf32> to vector<8x32xf32>
    %77 = vector.shape_cast %74 : vector<8x32xf32> to vector<1x1x8x32xf32>
    tpu.vector_store %arg5[%c0_30, %c1_31, %c0_32, %c0_33], %77 {strides = array<i32>} : memref<1x8x8x32xf32, #tpu.memory_space<vmem>>, vector<1x1x8x32xf32>,
    %c0_34 = arith.constant 0 : index
    %c2 = arith.constant 2 : index
    %c0_35 = arith.constant 0 : index
    %c0_36 = arith.constant 0 : index
    %78 = vector.load %arg1[%c0_34, %c2, %c0_35, %c0_36] : memref<1x8x8x64xf32, #tpu.memory_space<vmem>>, vector<1x1x8x64xf32>
    %79 = vector.shape_cast %78 : vector<1x1x8x64xf32> to vector<8x64xf32>
    %cst_37 = arith.constant dense<0.000000e+00> : vector<8x128xf32>
    %80 = tpu.matmul %79, %1, %cst_37 {dimension_numbers = #tpu.dot_dimension_numbers<[1], [0], [0], [1], [0, 0, 1, 1], [], []>} : vector<8x64xf32>, vector<64x128xf32>, vector<8x128xf32> -> vector<8x128xf32>
    %cst_38 = arith.constant dense<0.000000e+00> : vector<8x128xf32>
    %81 = tpu.matmul %74, %3, %cst_38 {dimension_numbers = #tpu.dot_dimension_numbers<[1], [0], [0], [1], [0, 0, 1, 1], [], []>} : vector<8x32xf32>, vector<32x128xf32>, vector<8x128xf32> -> vector<8x128xf32>
    %82 = arith.addf %80, %81 : vector<8x128xf32>
    %83 = vector.broadcast %5 : vector<1x128xf32> to vector<8x128xf32>
    %84 = arith.addf %82, %83 : vector<8x128xf32>
    %85 = vector.extract_strided_slice %84 {offsets = [0, 0], sizes = [8, 32], strides = [1, 1]} : vector<8x128xf32> to vector<8x32xf32>
    %86 = arith.negf %85 : vector<8x32xf32>
    %87 = math.exp %86 : vector<8x32xf32>
    %cst_39 = arith.constant 1.000000e+00 : f32
    %88 = vector.broadcast %cst_39 : f32 to vector<8x32xf32>
    %89 = arith.addf %88, %87 : vector<8x32xf32>
    %90 = arith.divf %88, %89 : vector<8x32xf32>
    %91 = vector.extract_strided_slice %84 {offsets = [0, 32], sizes = [8, 32], strides = [1, 1]} : vector<8x128xf32> to vector<8x32xf32>
    %92 = arith.negf %91 : vector<8x32xf32>
    %93 = math.exp %92 : vector<8x32xf32>
    %cst_40 = arith.constant 1.000000e+00 : f32
    %94 = vector.broadcast %cst_40 : f32 to vector<8x32xf32>
    %95 = arith.addf %94, %93 : vector<8x32xf32>
    %96 = arith.divf %94, %95 : vector<8x32xf32>
    %97 = vector.extract_strided_slice %84 {offsets = [0, 64], sizes = [8, 32], strides = [1, 1]} : vector<8x128xf32> to vector<8x32xf32>
    %98 = math.tanh %97 : vector<8x32xf32>
    %99 = vector.extract_strided_slice %84 {offsets = [0, 96], sizes = [8, 32], strides = [1, 1]} : vector<8x128xf32> to vector<8x32xf32>
    %100 = arith.negf %99 : vector<8x32xf32>
    %101 = math.exp %100 : vector<8x32xf32>
    %cst_41 = arith.constant 1.000000e+00 : f32
    %102 = vector.broadcast %cst_41 : f32 to vector<8x32xf32>
    %103 = arith.addf %102, %101 : vector<8x32xf32>
    %104 = arith.divf %102, %103 : vector<8x32xf32>
    %105 = arith.mulf %96, %72 : vector<8x32xf32>
    %106 = arith.mulf %90, %98 : vector<8x32xf32>
    %107 = arith.addf %105, %106 : vector<8x32xf32>
    %108 = math.tanh %107 : vector<8x32xf32>
    %109 = arith.mulf %104, %108 : vector<8x32xf32>
    %c0_42 = arith.constant 0 : index
    %c2_43 = arith.constant 2 : index
    %c0_44 = arith.constant 0 : index
    %c0_45 = arith.constant 0 : index
    %110 = vector.load %arg5[%c0_42, %c2_43, %c0_44, %c0_45] : memref<1x8x8x32xf32, #tpu.memory_space<vmem>>, vector<1x1x8x32xf32>
    %111 = vector.shape_cast %110 : vector<1x1x8x32xf32> to vector<8x32xf32>
    %112 = vector.shape_cast %109 : vector<8x32xf32> to vector<1x1x8x32xf32>
    tpu.vector_store %arg5[%c0_42, %c2_43, %c0_44, %c0_45], %112 {strides = array<i32>} : memref<1x8x8x32xf32, #tpu.memory_space<vmem>>, vector<1x1x8x32xf32>,
    %c0_46 = arith.constant 0 : index
    %c3 = arith.constant 3 : index
    %c0_47 = arith.constant 0 : index
    %c0_48 = arith.constant 0 : index
    %113 = vector.load %arg1[%c0_46, %c3, %c0_47, %c0_48] : memref<1x8x8x64xf32, #tpu.memory_space<vmem>>, vector<1x1x8x64xf32>
    %114 = vector.shape_cast %113 : vector<1x1x8x64xf32> to vector<8x64xf32>
    %cst_49 = arith.constant dense<0.000000e+00> : vector<8x128xf32>
    %115 = tpu.matmul %114, %1, %cst_49 {dimension_numbers = #tpu.dot_dimension_numbers<[1], [0], [0], [1], [0, 0, 1, 1], [], []>} : vector<8x64xf32>, vector<64x128xf32>, vector<8x128xf32> -> vector<8x128xf32>
    %cst_50 = arith.constant dense<0.000000e+00> : vector<8x128xf32>
    %116 = tpu.matmul %109, %3, %cst_50 {dimension_numbers = #tpu.dot_dimension_numbers<[1], [0], [0], [1], [0, 0, 1, 1], [], []>} : vector<8x32xf32>, vector<32x128xf32>, vector<8x128xf32> -> vector<8x128xf32>
    %117 = arith.addf %115, %116 : vector<8x128xf32>
    %118 = vector.broadcast %5 : vector<1x128xf32> to vector<8x128xf32>
    %119 = arith.addf %117, %118 : vector<8x128xf32>
    %120 = vector.extract_strided_slice %119 {offsets = [0, 0], sizes = [8, 32], strides = [1, 1]} : vector<8x128xf32> to vector<8x32xf32>
    %121 = arith.negf %120 : vector<8x32xf32>
    %122 = math.exp %121 : vector<8x32xf32>
    %cst_51 = arith.constant 1.000000e+00 : f32
    %123 = vector.broadcast %cst_51 : f32 to vector<8x32xf32>
    %124 = arith.addf %123, %122 : vector<8x32xf32>
    %125 = arith.divf %123, %124 : vector<8x32xf32>
    %126 = vector.extract_strided_slice %119 {offsets = [0, 32], sizes = [8, 32], strides = [1, 1]} : vector<8x128xf32> to vector<8x32xf32>
    %127 = arith.negf %126 : vector<8x32xf32>
    %128 = math.exp %127 : vector<8x32xf32>
    %cst_52 = arith.constant 1.000000e+00 : f32
    %129 = vector.broadcast %cst_52 : f32 to vector<8x32xf32>
    %130 = arith.addf %129, %128 : vector<8x32xf32>
    %131 = arith.divf %129, %130 : vector<8x32xf32>
    %132 = vector.extract_strided_slice %119 {offsets = [0, 64], sizes = [8, 32], strides = [1, 1]} : vector<8x128xf32> to vector<8x32xf32>
    %133 = math.tanh %132 : vector<8x32xf32>
    %134 = vector.extract_strided_slice %119 {offsets = [0, 96], sizes = [8, 32], strides = [1, 1]} : vector<8x128xf32> to vector<8x32xf32>
    %135 = arith.negf %134 : vector<8x32xf32>
    %136 = math.exp %135 : vector<8x32xf32>
    %cst_53 = arith.constant 1.000000e+00 : f32
    %137 = vector.broadcast %cst_53 : f32 to vector<8x32xf32>
    %138 = arith.addf %137, %136 : vector<8x32xf32>
    %139 = arith.divf %137, %138 : vector<8x32xf32>
    %140 = arith.mulf %131, %107 : vector<8x32xf32>
    %141 = arith.mulf %125, %133 : vector<8x32xf32>
    %142 = arith.addf %140, %141 : vector<8x32xf32>
    %143 = math.tanh %142 : vector<8x32xf32>
    %144 = arith.mulf %139, %143 : vector<8x32xf32>
    %c0_54 = arith.constant 0 : index
    %c3_55 = arith.constant 3 : index
    %c0_56 = arith.constant 0 : index
    %c0_57 = arith.constant 0 : index
    %145 = vector.load %arg5[%c0_54, %c3_55, %c0_56, %c0_57] : memref<1x8x8x32xf32, #tpu.memory_space<vmem>>, vector<1x1x8x32xf32>
    %146 = vector.shape_cast %145 : vector<1x1x8x32xf32> to vector<8x32xf32>
    %147 = vector.shape_cast %144 : vector<8x32xf32> to vector<1x1x8x32xf32>
    tpu.vector_store %arg5[%c0_54, %c3_55, %c0_56, %c0_57], %147 {strides = array<i32>} : memref<1x8x8x32xf32, #tpu.memory_space<vmem>>, vector<1x1x8x32xf32>,
    %c0_58 = arith.constant 0 : index
    %c4 = arith.constant 4 : index
    %c0_59 = arith.constant 0 : index
    %c0_60 = arith.constant 0 : index
    %148 = vector.load %arg1[%c0_58, %c4, %c0_59, %c0_60] : memref<1x8x8x64xf32, #tpu.memory_space<vmem>>, vector<1x1x8x64xf32>
    %149 = vector.shape_cast %148 : vector<1x1x8x64xf32> to vector<8x64xf32>
    %cst_61 = arith.constant dense<0.000000e+00> : vector<8x128xf32>
    %150 = tpu.matmul %149, %1, %cst_61 {dimension_numbers = #tpu.dot_dimension_numbers<[1], [0], [0], [1], [0, 0, 1, 1], [], []>} : vector<8x64xf32>, vector<64x128xf32>, vector<8x128xf32> -> vector<8x128xf32>
    %cst_62 = arith.constant dense<0.000000e+00> : vector<8x128xf32>
    %151 = tpu.matmul %144, %3, %cst_62 {dimension_numbers = #tpu.dot_dimension_numbers<[1], [0], [0], [1], [0, 0, 1, 1], [], []>} : vector<8x32xf32>, vector<32x128xf32>, vector<8x128xf32> -> vector<8x128xf32>
    %152 = arith.addf %150, %151 : vector<8x128xf32>
    %153 = vector.broadcast %5 : vector<1x128xf32> to vector<8x128xf32>
    %154 = arith.addf %152, %153 : vector<8x128xf32>
    %155 = vector.extract_strided_slice %154 {offsets = [0, 0], sizes = [8, 32], strides = [1, 1]} : vector<8x128xf32> to vector<8x32xf32>
    %156 = arith.negf %155 : vector<8x32xf32>
    %157 = math.exp %156 : vector<8x32xf32>
    %cst_63 = arith.constant 1.000000e+00 : f32
    %158 = vector.broadcast %cst_63 : f32 to vector<8x32xf32>
    %159 = arith.addf %158, %157 : vector<8x32xf32>
    %160 = arith.divf %158, %159 : vector<8x32xf32>
    %161 = vector.extract_strided_slice %154 {offsets = [0, 32], sizes = [8, 32], strides = [1, 1]} : vector<8x128xf32> to vector<8x32xf32>
    %162 = arith.negf %161 : vector<8x32xf32>
    %163 = math.exp %162 : vector<8x32xf32>
    %cst_64 = arith.constant 1.000000e+00 : f32
    %164 = vector.broadcast %cst_64 : f32 to vector<8x32xf32>
    %165 = arith.addf %164, %163 : vector<8x32xf32>
    %166 = arith.divf %164, %165 : vector<8x32xf32>
    %167 = vector.extract_strided_slice %154 {offsets = [0, 64], sizes = [8, 32], strides = [1, 1]} : vector<8x128xf32> to vector<8x32xf32>
    %168 = math.tanh %167 : vector<8x32xf32>
    %169 = vector.extract_strided_slice %154 {offsets = [0, 96], sizes = [8, 32], strides = [1, 1]} : vector<8x128xf32> to vector<8x32xf32>
    %170 = arith.negf %169 : vector<8x32xf32>
    %171 = math.exp %170 : vector<8x32xf32>
    %cst_65 = arith.constant 1.000000e+00 : f32
    %172 = vector.broadcast %cst_65 : f32 to vector<8x32xf32>
    %173 = arith.addf %172, %171 : vector<8x32xf32>
    %174 = arith.divf %172, %173 : vector<8x32xf32>
    %175 = arith.mulf %166, %142 : vector<8x32xf32>
    %176 = arith.mulf %160, %168 : vector<8x32xf32>
    %177 = arith.addf %175, %176 : vector<8x32xf32>
    %178 = math.tanh %177 : vector<8x32xf32>
    %179 = arith.mulf %174, %178 : vector<8x32xf32>
    %c0_66 = arith.constant 0 : index
    %c4_67 = arith.constant 4 : index
    %c0_68 = arith.constant 0 : index
    %c0_69 = arith.constant 0 : index
    %180 = vector.load %arg5[%c0_66, %c4_67, %c0_68, %c0_69] : memref<1x8x8x32xf32, #tpu.memory_space<vmem>>, vector<1x1x8x32xf32>
    %181 = vector.shape_cast %180 : vector<1x1x8x32xf32> to vector<8x32xf32>
    %182 = vector.shape_cast %179 : vector<8x32xf32> to vector<1x1x8x32xf32>
    tpu.vector_store %arg5[%c0_66, %c4_67, %c0_68, %c0_69], %182 {strides = array<i32>} : memref<1x8x8x32xf32, #tpu.memory_space<vmem>>, vector<1x1x8x32xf32>,
    %c0_70 = arith.constant 0 : index
    %c5 = arith.constant 5 : index
    %c0_71 = arith.constant 0 : index
    %c0_72 = arith.constant 0 : index
    %183 = vector.load %arg1[%c0_70, %c5, %c0_71, %c0_72] : memref<1x8x8x64xf32, #tpu.memory_space<vmem>>, vector<1x1x8x64xf32>
    %184 = vector.shape_cast %183 : vector<1x1x8x64xf32> to vector<8x64xf32>
    %cst_73 = arith.constant dense<0.000000e+00> : vector<8x128xf32>
    %185 = tpu.matmul %184, %1, %cst_73 {dimension_numbers = #tpu.dot_dimension_numbers<[1], [0], [0], [1], [0, 0, 1, 1], [], []>} : vector<8x64xf32>, vector<64x128xf32>, vector<8x128xf32> -> vector<8x128xf32>
    %cst_74 = arith.constant dense<0.000000e+00> : vector<8x128xf32>
    %186 = tpu.matmul %179, %3, %cst_74 {dimension_numbers = #tpu.dot_dimension_numbers<[1], [0], [0], [1], [0, 0, 1, 1], [], []>} : vector<8x32xf32>, vector<32x128xf32>, vector<8x128xf32> -> vector<8x128xf32>
    %187 = arith.addf %185, %186 : vector<8x128xf32>
    %188 = vector.broadcast %5 : vector<1x128xf32> to vector<8x128xf32>
    %189 = arith.addf %187, %188 : vector<8x128xf32>
    %190 = vector.extract_strided_slice %189 {offsets = [0, 0], sizes = [8, 32], strides = [1, 1]} : vector<8x128xf32> to vector<8x32xf32>
    %191 = arith.negf %190 : vector<8x32xf32>
    %192 = math.exp %191 : vector<8x32xf32>
    %cst_75 = arith.constant 1.000000e+00 : f32
    %193 = vector.broadcast %cst_75 : f32 to vector<8x32xf32>
    %194 = arith.addf %193, %192 : vector<8x32xf32>
    %195 = arith.divf %193, %194 : vector<8x32xf32>
    %196 = vector.extract_strided_slice %189 {offsets = [0, 32], sizes = [8, 32], strides = [1, 1]} : vector<8x128xf32> to vector<8x32xf32>
    %197 = arith.negf %196 : vector<8x32xf32>
    %198 = math.exp %197 : vector<8x32xf32>
    %cst_76 = arith.constant 1.000000e+00 : f32
    %199 = vector.broadcast %cst_76 : f32 to vector<8x32xf32>
    %200 = arith.addf %199, %198 : vector<8x32xf32>
    %201 = arith.divf %199, %200 : vector<8x32xf32>
    %202 = vector.extract_strided_slice %189 {offsets = [0, 64], sizes = [8, 32], strides = [1, 1]} : vector<8x128xf32> to vector<8x32xf32>
    %203 = math.tanh %202 : vector<8x32xf32>
    %204 = vector.extract_strided_slice %189 {offsets = [0, 96], sizes = [8, 32], strides = [1, 1]} : vector<8x128xf32> to vector<8x32xf32>
    %205 = arith.negf %204 : vector<8x32xf32>
    %206 = math.exp %205 : vector<8x32xf32>
    %cst_77 = arith.constant 1.000000e+00 : f32
    %207 = vector.broadcast %cst_77 : f32 to vector<8x32xf32>
    %208 = arith.addf %207, %206 : vector<8x32xf32>
    %209 = arith.divf %207, %208 : vector<8x32xf32>
    %210 = arith.mulf %201, %177 : vector<8x32xf32>
    %211 = arith.mulf %195, %203 : vector<8x32xf32>
    %212 = arith.addf %210, %211 : vector<8x32xf32>
    %213 = math.tanh %212 : vector<8x32xf32>
    %214 = arith.mulf %209, %213 : vector<8x32xf32>
    %c0_78 = arith.constant 0 : index
    %c5_79 = arith.constant 5 : index
    %c0_80 = arith.constant 0 : index
    %c0_81 = arith.constant 0 : index
    %215 = vector.load %arg5[%c0_78, %c5_79, %c0_80, %c0_81] : memref<1x8x8x32xf32, #tpu.memory_space<vmem>>, vector<1x1x8x32xf32>
    %216 = vector.shape_cast %215 : vector<1x1x8x32xf32> to vector<8x32xf32>
    %217 = vector.shape_cast %214 : vector<8x32xf32> to vector<1x1x8x32xf32>
    tpu.vector_store %arg5[%c0_78, %c5_79, %c0_80, %c0_81], %217 {strides = array<i32>} : memref<1x8x8x32xf32, #tpu.memory_space<vmem>>, vector<1x1x8x32xf32>,
    %c0_82 = arith.constant 0 : index
    %c6 = arith.constant 6 : index
    %c0_83 = arith.constant 0 : index
    %c0_84 = arith.constant 0 : index
    %218 = vector.load %arg1[%c0_82, %c6, %c0_83, %c0_84] : memref<1x8x8x64xf32, #tpu.memory_space<vmem>>, vector<1x1x8x64xf32>
    %219 = vector.shape_cast %218 : vector<1x1x8x64xf32> to vector<8x64xf32>
    %cst_85 = arith.constant dense<0.000000e+00> : vector<8x128xf32>
    %220 = tpu.matmul %219, %1, %cst_85 {dimension_numbers = #tpu.dot_dimension_numbers<[1], [0], [0], [1], [0, 0, 1, 1], [], []>} : vector<8x64xf32>, vector<64x128xf32>, vector<8x128xf32> -> vector<8x128xf32>
    %cst_86 = arith.constant dense<0.000000e+00> : vector<8x128xf32>
    %221 = tpu.matmul %214, %3, %cst_86 {dimension_numbers = #tpu.dot_dimension_numbers<[1], [0], [0], [1], [0, 0, 1, 1], [], []>} : vector<8x32xf32>, vector<32x128xf32>, vector<8x128xf32> -> vector<8x128xf32>
    %222 = arith.addf %220, %221 : vector<8x128xf32>
    %223 = vector.broadcast %5 : vector<1x128xf32> to vector<8x128xf32>
    %224 = arith.addf %222, %223 : vector<8x128xf32>
    %225 = vector.extract_strided_slice %224 {offsets = [0, 0], sizes = [8, 32], strides = [1, 1]} : vector<8x128xf32> to vector<8x32xf32>
    %226 = arith.negf %225 : vector<8x32xf32>
    %227 = math.exp %226 : vector<8x32xf32>
    %cst_87 = arith.constant 1.000000e+00 : f32
    %228 = vector.broadcast %cst_87 : f32 to vector<8x32xf32>
    %229 = arith.addf %228, %227 : vector<8x32xf32>
    %230 = arith.divf %228, %229 : vector<8x32xf32>
    %231 = vector.extract_strided_slice %224 {offsets = [0, 32], sizes = [8, 32], strides = [1, 1]} : vector<8x128xf32> to vector<8x32xf32>
    %232 = arith.negf %231 : vector<8x32xf32>
    %233 = math.exp %232 : vector<8x32xf32>
    %cst_88 = arith.constant 1.000000e+00 : f32
    %234 = vector.broadcast %cst_88 : f32 to vector<8x32xf32>
    %235 = arith.addf %234, %233 : vector<8x32xf32>
    %236 = arith.divf %234, %235 : vector<8x32xf32>
    %237 = vector.extract_strided_slice %224 {offsets = [0, 64], sizes = [8, 32], strides = [1, 1]} : vector<8x128xf32> to vector<8x32xf32>
    %238 = math.tanh %237 : vector<8x32xf32>
    %239 = vector.extract_strided_slice %224 {offsets = [0, 96], sizes = [8, 32], strides = [1, 1]} : vector<8x128xf32> to vector<8x32xf32>
    %240 = arith.negf %239 : vector<8x32xf32>
    %241 = math.exp %240 : vector<8x32xf32>
    %cst_89 = arith.constant 1.000000e+00 : f32
    %242 = vector.broadcast %cst_89 : f32 to vector<8x32xf32>
    %243 = arith.addf %242, %241 : vector<8x32xf32>
    %244 = arith.divf %242, %243 : vector<8x32xf32>
    %245 = arith.mulf %236, %212 : vector<8x32xf32>
    %246 = arith.mulf %230, %238 : vector<8x32xf32>
    %247 = arith.addf %245, %246 : vector<8x32xf32>
    %248 = math.tanh %247 : vector<8x32xf32>
    %249 = arith.mulf %244, %248 : vector<8x32xf32>
    %c0_90 = arith.constant 0 : index
    %c6_91 = arith.constant 6 : index
    %c0_92 = arith.constant 0 : index
    %c0_93 = arith.constant 0 : index
    %250 = vector.load %arg5[%c0_90, %c6_91, %c0_92, %c0_93] : memref<1x8x8x32xf32, #tpu.memory_space<vmem>>, vector<1x1x8x32xf32>
    %251 = vector.shape_cast %250 : vector<1x1x8x32xf32> to vector<8x32xf32>
    %252 = vector.shape_cast %249 : vector<8x32xf32> to vector<1x1x8x32xf32>
    tpu.vector_store %arg5[%c0_90, %c6_91, %c0_92, %c0_93], %252 {strides = array<i32>} : memref<1x8x8x32xf32, #tpu.memory_space<vmem>>, vector<1x1x8x32xf32>,
    %c0_94 = arith.constant 0 : index
    %c7 = arith.constant 7 : index
    %c0_95 = arith.constant 0 : index
    %c0_96 = arith.constant 0 : index
    %253 = vector.load %arg1[%c0_94, %c7, %c0_95, %c0_96] : memref<1x8x8x64xf32, #tpu.memory_space<vmem>>, vector<1x1x8x64xf32>
    %254 = vector.shape_cast %253 : vector<1x1x8x64xf32> to vector<8x64xf32>
    %cst_97 = arith.constant dense<0.000000e+00> : vector<8x128xf32>
    %255 = tpu.matmul %254, %1, %cst_97 {dimension_numbers = #tpu.dot_dimension_numbers<[1], [0], [0], [1], [0, 0, 1, 1], [], []>} : vector<8x64xf32>, vector<64x128xf32>, vector<8x128xf32> -> vector<8x128xf32>
    %cst_98 = arith.constant dense<0.000000e+00> : vector<8x128xf32>
    %256 = tpu.matmul %249, %3, %cst_98 {dimension_numbers = #tpu.dot_dimension_numbers<[1], [0], [0], [1], [0, 0, 1, 1], [], []>} : vector<8x32xf32>, vector<32x128xf32>, vector<8x128xf32> -> vector<8x128xf32>
    %257 = arith.addf %255, %256 : vector<8x128xf32>
    %258 = vector.broadcast %5 : vector<1x128xf32> to vector<8x128xf32>
    %259 = arith.addf %257, %258 : vector<8x128xf32>
    %260 = vector.extract_strided_slice %259 {offsets = [0, 0], sizes = [8, 32], strides = [1, 1]} : vector<8x128xf32> to vector<8x32xf32>
    %261 = arith.negf %260 : vector<8x32xf32>
    %262 = math.exp %261 : vector<8x32xf32>
    %cst_99 = arith.constant 1.000000e+00 : f32
    %263 = vector.broadcast %cst_99 : f32 to vector<8x32xf32>
    %264 = arith.addf %263, %262 : vector<8x32xf32>
    %265 = arith.divf %263, %264 : vector<8x32xf32>
    %266 = vector.extract_strided_slice %259 {offsets = [0, 32], sizes = [8, 32], strides = [1, 1]} : vector<8x128xf32> to vector<8x32xf32>
    %267 = arith.negf %266 : vector<8x32xf32>
    %268 = math.exp %267 : vector<8x32xf32>
    %cst_100 = arith.constant 1.000000e+00 : f32
    %269 = vector.broadcast %cst_100 : f32 to vector<8x32xf32>
    %270 = arith.addf %269, %268 : vector<8x32xf32>
    %271 = arith.divf %269, %270 : vector<8x32xf32>
    %272 = vector.extract_strided_slice %259 {offsets = [0, 64], sizes = [8, 32], strides = [1, 1]} : vector<8x128xf32> to vector<8x32xf32>
    %273 = math.tanh %272 : vector<8x32xf32>
    %274 = vector.extract_strided_slice %259 {offsets = [0, 96], sizes = [8, 32], strides = [1, 1]} : vector<8x128xf32> to vector<8x32xf32>
    %275 = arith.negf %274 : vector<8x32xf32>
    %276 = math.exp %275 : vector<8x32xf32>
    %cst_101 = arith.constant 1.000000e+00 : f32
    %277 = vector.broadcast %cst_101 : f32 to vector<8x32xf32>
    %278 = arith.addf %277, %276 : vector<8x32xf32>
    %279 = arith.divf %277, %278 : vector<8x32xf32>
    %280 = arith.mulf %271, %247 : vector<8x32xf32>
    %281 = arith.mulf %265, %273 : vector<8x32xf32>
    %282 = arith.addf %280, %281 : vector<8x32xf32>
    %283 = math.tanh %282 : vector<8x32xf32>
    %284 = arith.mulf %279, %283 : vector<8x32xf32>
    %c0_102 = arith.constant 0 : index
    %c7_103 = arith.constant 7 : index
    %c0_104 = arith.constant 0 : index
    %c0_105 = arith.constant 0 : index
    %285 = vector.load %arg5[%c0_102, %c7_103, %c0_104, %c0_105] : memref<1x8x8x32xf32, #tpu.memory_space<vmem>>, vector<1x1x8x32xf32>
    %286 = vector.shape_cast %285 : vector<1x1x8x32xf32> to vector<8x32xf32>
    %287 = vector.shape_cast %284 : vector<8x32xf32> to vector<1x1x8x32xf32>
    tpu.vector_store %arg5[%c0_102, %c7_103, %c0_104, %c0_105], %287 {strides = array<i32>} : memref<1x8x8x32xf32, #tpu.memory_space<vmem>>, vector<1x1x8x32xf32>,
    return
  }
  func.func @transform_0(%arg0: i32) -> (i32, i32, i32, i32) {
    %c0_i32 = arith.constant 0 : i32
    %c0_i32_0 = arith.constant 0 : i32
    %c0_i32_1 = arith.constant 0 : i32
    %c0_i32_2 = arith.constant 0 : i32
    return %arg0, %c0_i32, %c0_i32_0, %c0_i32_1 : i32, i32, i32, i32
  }
  func.func @transform_1(%arg0: i32) -> (i32, i32, i32) {
    %c0_i32 = arith.constant 0 : i32
    %c0_i32_0 = arith.constant 0 : i32
    %c0_i32_1 = arith.constant 0 : i32
    return %arg0, %c0_i32, %c0_i32_0 : i32, i32, i32
  }
  func.func @transform_2(%arg0: i32) -> (i32, i32, i32) {
    %c0_i32 = arith.constant 0 : i32
    %c0_i32_0 = arith.constant 0 : i32
    %c0_i32_1 = arith.constant 0 : i32
    return %arg0, %c0_i32, %c0_i32_0 : i32, i32, i32
  }
  func.func @transform_3(%arg0: i32) -> (i32, i32, i32) {
    %c0_i32 = arith.constant 0 : i32
    %c0_i32_0 = arith.constant 0 : i32
    %c0_i32_1 = arith.constant 0 : i32
    return %arg0, %c0_i32, %c0_i32_0 : i32, i32, i32
  }
  func.func @transform_4(%arg0: i32) -> (i32, i32, i32, i32) {
    %c0_i32 = arith.constant 0 : i32
    %c0_i32_0 = arith.constant 0 : i32
    %c0_i32_1 = arith.constant 0 : i32
    %c0_i32_2 = arith.constant 0 : i32
    return %arg0, %c0_i32, %c0_i32_0, %c0_i32_1 : i32, i32, i32, i32
  }
}

</mosaic_0001>

<bundles_post_ra>
// kernel: lstm_forward.5
= control target key start
LH: loop header
LB: loop body
LE: loop exit
PB: predicated region body
PF: predicated region fallthrough
CT: control target
= control target key end

     0   :  { %vm21_vm0 = vcmask 523264   ;;  %vm28_vm1 = vcmask 7168   ;;  %s67_s0 = inlined_call_operand.vmem [shape: f32[8,64], index: 0, kind: input, shape index: {}]   ;;  %s68_s1 = inlined_call_operand.vmem [shape: f32[1,64], index: 1, kind: input, shape index: {}]   ;;  %s69_s2 = inlined_call_operand.<no memory space> [shape: f32[1,1], index: 2, kind: input, shape index: {}]   ;;  %s70_s3 = inlined_call_operand.vmem [shape: f32[8,1], index: 3, kind: output, shape index: {}]  }
   0x1   :  { %v15_v0 = vld [vmem:[%s67_s0] sm:$0xff]  ;;  %v26_v4 = vstv %s69_s2 }
   0x2   :  { %v34_v1 = vld [vmem:[%s68_s1] ss:$0 sm:$0xff] }
   0x3   :  { %v20_v2 = vmul.f32 %v34_v1, %v15_v0 }
   0x5   :  { %v22_v3 = vsel %vm21_vm0, %v20_v2, 0.0 }
   0x6   :  { %23 = vadd.xlane.f32.xlu0 %v22_v3 }
  0x79   :  { %v24_v5 = vpop.xlane.xlu0 %23 }
  0x7a   :  { %v27_v6 = vadd.f32 %v26_v4, %v24_v5 }
  0x7c   :  { %29 = vst.msk [vmem:[%s70_s3] sm:$0xff] %vm28_vm1, %v27_v6 }

// kernel: lstm_forward.3
= control target key start
LH: loop header
LB: loop body
LE: loop exit
PB: predicated region body
PF: predicated region fallthrough
CT: control target
= control target key end

     0   :  { %s1248_s15 = smov 0   ;;  %s1453_s0 = inlined_call_operand.vmem [shape: f32[2,8,8,32], index: 0, kind: input, shape index: {}]   ;;  %s1454_s1 = inlined_call_operand.vmem [shape: f32[2,32,128], index: 1, kind: input, shape index: {}]   ;;  %s1455_s2 = inlined_call_operand.vmem [shape: f32[2,32,128], index: 2, kind: input, shape index: {}]   ;;  %s1456_s3 = inlined_call_operand.vmem [shape: f32[2,1,128], index: 3, kind: input, shape index: {}]   ;;  %s1457_s4 = inlined_call_operand.vmem [shape: f32[2,8,8,32], index: 4, kind: output, shape index: {}]  }
   0x1 LB: > { %s1080_s16 = sadd.s32 4294967295, %s1218_s15   ;;  %p1084_p0 = scmp.ge.s32.totalorder %s1218_s15, 1  ;;  %s1218_s15 = sphi %s1248_s15, %s14_s15  }
   0x2   : > { %p190_p1 = scmp.lt.s32.totalorder %s1218_s15, 3 }
   0x4   : > { %p191_p2 = pnand %p1084_p0, %p190_p1 }
   0x5   : > { %p229_p3 = scmp.lt.s32.totalorder (!%p191_p2), %s1080_s16, 1  ;;  %s1221_s7 = smov (!%p191_p2), 64  }
   0x6   : > { %194 = sbr.rel (%p191_p2) target bundleno = 4688 (0x1250), region = 36  ;;  %s1222_s8 = smov (!%p191_p2), 32  }
   0xb   : > { %s1459_s16 = smov (!%p229_p3, %s1080_s16), 1  ;;  %vm262_vm0 = vcmask 261120   ;;  %v1220_v9 = vmov 0.0  }
   0xc   : > { %s1133_s17 = sshll.u32 %s1459_s16, 5  ;;  %s246_s20 = scalar_lea.vmem %s1456_s3, %s1459_s16 }
   0xd   : > { %s243_s23 = scalar_lea.vmem %s1455_s2, %s1133_s17  ;;  %s238_s26 = scalar_lea.vmem %s1454_s1, %s1133_s17  ;;  %v1340_v10 = vld [vmem:[%s246_s20] ss:$0 sm:$0xff] }
   0xe   : > { %v1269_v0 = vld [vmem:[%s243_s23 + $0x18] sm:$0xff]  ;;  %v1273_v2 = vld [vmem:[%s243_s23 + $0x10] sm:$0xff]  ;;  %s1132_s27 = sshll.u32 %s1459_s16, 6  ;;  %v1280_v4 = vld [vmem:[%s243_s23 + $0x8] sm:$0xff] }
   0xf   : > { %v1271_v1 = vld [vmem:[%s238_s26 + $0x18] sm:$0xff]  ;;  %278 = vmatpush.msra.mxu0 %v1269_v0  ;;  %v1278_v3 = vld [vmem:[%s238_s26 + $0x10] sm:$0xff]  ;;  %v1282_v5 = vld [vmem:[%s238_s26 + $0x8] sm:$0xff]  ;;  %s1289_s30 = scalar_lea.vmem %s1453_s0, %s1132_s27  ;;  %371 = vmatpush.msra.mxu2 %v1269_v0  ;;  %s1358_s11 = scalar_lea.vmem %s1457_s4, %s1132_s27 }
  0x10   : > { %301 = vmatpush.msra.mxu1 %v1271_v1  ;;  %394 = vmatpush.msra.mxu3 %v1271_v1  ;;  %v1295_v6 = vld [vmem:[%s243_s23] sm:$0xff]  ;;  %v1095_v37 = vld [vmem:[%s1289_s30 + $0x8] sm:$0xff] }
  0x11   : > { %279 = vmatpush.msra.mxu0 %v1273_v2  ;;  %v1297_v7 = vld [vmem:[%s238_s26] sm:$0xff]  ;;  %372 = vmatpush.msra.mxu2 %v1273_v2 }
  0x12   : > { %302 = vmatpush.msra.mxu1 %v1278_v3  ;;  %395 = vmatpush.msra.mxu3 %v1278_v3  ;;  %v261_v8 = vld [vmem:[%s1289_s30] sm:$0xff] }
  0x13   : > { %280 = vmatpush.msra.mxu0 %v1280_v4  ;;  %373 = vmatpush.msra.mxu2 %v1280_v4 }
  0x14   : > { %303 = vmatpush.msra.mxu1 %v1282_v5  ;;  %396 = vmatpush.msra.mxu3 %v1282_v5 }
  0x15   : > { %281 = vmatpush.msra.mxu0 %v1295_v6  ;;  %374 = vmatpush.msra.mxu2 %v1295_v6 }
  0x16   : > { %304 = vmatpush.msra.mxu1 %v1297_v7  ;;  %282 = vmatmul.f32.vlgmr.msra.gmra.mxu0 %v1220_v9  ;;  %v1100_v9 = vld [vmem:[%s1289_s30 + $0x10] sm:$0xff] }
  0x17   : > { %1093 = vmatmul.msk.f32.vlgmr.msra.gmra.mxu1 %vm262_vm0, %v261_v8  ;;  %397 = vmatpush.msra.mxu3 %v1297_v7 }
  0x18   : > { %462 = vmatpush.msrb.mxu0 %v1269_v0  ;;  %485 = vmatpush.msrb.mxu1 %v1271_v1 }
  0x19   : > { %553 = vmatpush.msrb.mxu2 %v1269_v0  ;;  %576 = vmatpush.msrb.mxu3 %v1271_v1 }
  0x1a   : > { %463 = vmatpush.msrb.mxu0 %v1273_v2  ;;  %486 = vmatpush.msrb.mxu1 %v1278_v3 }
  0x1b   : > { %554 = vmatpush.msrb.mxu2 %v1273_v2  ;;  %577 = vmatpush.msrb.mxu3 %v1278_v3 }
  0x1c   : > { %464 = vmatpush.msrb.mxu0 %v1280_v4  ;;  %487 = vmatpush.msrb.mxu1 %v1282_v5 }
  0x1d   : > { %555 = vmatpush.msrb.mxu2 %v1280_v4  ;;  %578 = vmatpush.msrb.mxu3 %v1282_v5 }
  0x1e   : > { %465 = vmatpush.msrb.mxu0 %v1295_v6  ;;  %488 = vmatpush.msrb.mxu1 %v1297_v7 }
  0x1f   : > { %556 = vmatpush.msrb.mxu2 %v1295_v6  ;;  %579 = vmatpush.msrb.mxu3 %v1297_v7 }
  0x20   : > { %644 = vmatpush.msra.mxu0 %v1269_v0  ;;  %667 = vmatpush.msra.mxu1 %v1271_v1 }
  0x21   : > { %1097 = vmatmul.msk.f32.vlgmr.msra.gmra.mxu3 %vm262_vm0, %v1095_v37  ;;  %1102 = vmatmul.msk.f32.vlgmr.msrb.gmra.mxu1 %vm262_vm0, %v1100_v9 }
  0x22   : > { %645 = vmatpush.msra.mxu0 %v1273_v2  ;;  %668 = vmatpush.msra.mxu1 %v1278_v3 }
  0x23   : > { %758 = vmatpush.msra.mxu3 %v1271_v1 }
  0x24   : > { %646 = vmatpush.msra.mxu0 %v1280_v4  ;;  %669 = vmatpush.msra.mxu1 %v1282_v5 }
  0x25   : > { %759 = vmatpush.msra.mxu3 %v1278_v3 }
  0x26   : > { %647 = vmatpush.msra.mxu0 %v1295_v6  ;;  %670 = vmatpush.msra.mxu1 %v1297_v7 }
  0x27   : > { %760 = vmatpush.msra.mxu3 %v1282_v5 }
  0x28   : > { %849 = vmatpush.msrb.mxu1 %v1271_v1 }
  0x29   : > { %761 = vmatpush.msra.mxu3 %v1297_v7 }
  0x2a   : > { %850 = vmatpush.msrb.mxu1 %v1278_v3 }
  0x2c   : > { %851 = vmatpush.msrb.mxu1 %v1282_v5 }
  0x2e   : > { %852 = vmatpush.msrb.mxu1 %v1297_v7 }
  0x93   : > { %v283_v11 = vpop.f32.mrf.mxu0 }
  0x94   : > { %v306_v12 = vpop.f32.mrf.mxu1 }
  0x95   : > { %v307_v13 = vadd.f32 %v306_v12, %v283_v11 }
  0x97   : > { %v312_v14 = vadd.f32 %v1340_v10, %v307_v13 }
  0x99   : > { %1148 = vtanh.f32 %v312_v14  ;;  %v1094_v16 = vmul.f32 -1.442695, %v312_v14 }
  0x9b   : > { %1150 = vpow2.f32 %v1094_v16 }
  0x9e   : > { %v490_v12 = vpop.f32.mrf.mxu1 }
  0x9f   : > { %v1149_v15 = vpop.eup %1148 }
  0xa0   : > { %335 = vrot.lane.b32.xlu0 %v1149_v15, %s1221_s7 }
  0xa1   : > { %v1151_v17 = vpop.eup %1150 }
  0xa2   : > { %v316_v18 = vadd.f32 1.0, %v1151_v17 }
  0xa4   : > { %1152 = vrcp.f32 %v316_v18  ;;  %v328_v24 = vand.u32 2147483648, %v316_v18  ;;  %vm322_vm2 = vweird.f32 %v316_v18  ;;  %v326_v25 = vand.u32 2147483647, %v316_v18  ;;  %v399_v39 = vpop.f32.mrf.mxu3 }
  0xa6   : > { %v329_v27 = vor.u32 1.1754944e-38, %v328_v24  ;;  %vm327_vm4 = vcmp.eq.f32.partialorder %v326_v25, 8.507059e+37 }
  0xaa   : > { %v1153_v19 = vpop.eup %1152 }
  0xab   : > { %v318_v20 = vmul.f32 %v1153_v19, %v316_v18  ;;  %vm323_vm1 = vweird.f32 %v1153_v19 }
  0xac   : > { %vm324_vm3 = vmor %vm322_vm2, %vm323_vm1 }
  0xad   : > { %v319_v21 = vsub.f32 1.0, %v318_v20 }
  0xaf   : > { %v320_v22 = vmul.f32 %v1153_v19, %v319_v21 }
  0xb1   : > { %v321_v23 = vadd.f32 %v1153_v19, %v320_v22 }
  0xb3   : > { %v325_v26 = vsel %vm324_vm3, %v1153_v19, %v321_v23 }
  0xb4   : > { %v330_v29 = vsel %vm327_vm4, %v329_v27, %v325_v26 }
  0xb5   : > { %v333_v31 = vmul.f32 0.0, %v330_v29 }
 0x112   : > { %v336_v28 = vpop.permute.xlu0 %335 }
 0x113   : > { %v338_v30 = vmul.f32 %v336_v28, %v330_v29 }
 0x115   : > { %340 = vrot.lane.b32.xlu0 %v338_v30, %s1222_s8 }
 0x187   : > { %v341_v32 = vpop.permute.xlu0 %340 }
 0x188   : > { %v343_v33 = vadd.f32 %v341_v32, %v333_v31 }
 0x18a   : > { %1154 = vtanh.f32 %v343_v33 }
 0x190   : > { %v1155_v34 = vpop.eup %1154 }
 0x191   : > { %346 = vrot.lane.b32.xlu1 %v1155_v34, %s1221_s7 }
 0x203   : > { %v347_v35 = vpop.permute.xlu1 %346 }
 0x204   : > { %v349_v36 = vmul.f32 %v347_v35, %v330_v29 }
 0x206   : > { %351 = vrot.lane.b32.xlu1 %v349_v36, %s1222_s8 }
 0x278   : > { %v352_v38 = vpop.permute.xlu1 %351 }
 0x279   : > { %354 = vst.msk [vmem:[%s1358_s11] sm:$0xff] %vm262_vm0, %v352_v38  ;;  %1096 = vmatmul.msk.f32.vlgmr.msra.gmra.mxu2 %vm262_vm0, %v352_v38  ;;  %v1105_v38 = vld [vmem:[%s1289_s30 + $0x18] sm:$0xff] }
 0x27a   : > { %735 = vmatpush.msra.mxu2 %v1269_v0  ;;  %1107 = vmatmul.msk.f32.vlgmr.msrb.gmra.mxu3 %vm262_vm0, %v1105_v38 }
 0x27b   : > { %940 = vmatpush.msrb.mxu3 %v1271_v1 }
 0x27c   : > { %736 = vmatpush.msra.mxu2 %v1273_v2 }
 0x27d   : > { %941 = vmatpush.msrb.mxu3 %v1278_v3 }
 0x27e   : > { %737 = vmatpush.msra.mxu2 %v1280_v4 }
 0x27f   : > { %942 = vmatpush.msrb.mxu3 %v1282_v5 }
 0x280   : > { %738 = vmatpush.msra.mxu2 %v1295_v6 }
 0x281   : > { %943 = vmatpush.msrb.mxu3 %v1297_v7 }
 0x2fc   : > { %v376_v40 = vpop.f32.mrf.mxu2 }
 0x2fd   : > { %v400_v41 = vadd.f32 %v399_v39, %v376_v40  ;;  %v581_v1 = vpop.f32.mrf.mxu3 }
 0x2ff   : > { %v402_v42 = vadd.f32 %v1340_v10, %v400_v41 }
 0x301   : > { %1156 = vtanh.f32 %v402_v42  ;;  %v1098_v44 = vmul.f32 -1.442695, %v402_v42 }
 0x303   : > { %1158 = vpow2.f32 %v1098_v44 }
 0x307   : > { %v1157_v43 = vpop.eup %1156 }
 0x308   : > { %425 = vrot.lane.b32.xlu2 %v1157_v43, %s1221_s7 }
 0x309   : > { %v1159_v45 = vpop.eup %1158 }
 0x30a   : > { %v406_v46 = vadd.f32 1.0, %v1159_v45 }
 0x30c   : > { %1160 = vrcp.f32 %v406_v46  ;;  %v418_v52 = vand.u32 2147483648, %v406_v46  ;;  %vm412_vm6 = vweird.f32 %v406_v46  ;;  %v416_v53 = vand.u32 2147483647, %v406_v46 }
 0x30e   : > { %v419_v55 = vor.u32 1.1754944e-38, %v418_v52  ;;  %vm417_vm8 = vcmp.eq.f32.partialorder %v416_v53, 8.507059e+37 }
 0x312   : > { %v1161_v47 = vpop.eup %1160 }
 0x313   : > { %v408_v48 = vmul.f32 %v1161_v47, %v406_v46  ;;  %vm413_vm5 = vweird.f32 %v1161_v47 }
 0x314   : > { %vm414_vm7 = vmor %vm412_vm6, %vm413_vm5 }
 0x315   : > { %v409_v49 = vsub.f32 1.0, %v408_v48 }
 0x317   : > { %v410_v50 = vmul.f32 %v1161_v47, %v409_v49 }
 0x319   : > { %v411_v51 = vadd.f32 %v1161_v47, %v410_v50 }
 0x31b   : > { %v415_v54 = vsel %vm414_vm7, %v1161_v47, %v411_v51 }
 0x31c   : > { %v420_v57 = vsel %vm417_vm8, %v419_v55, %v415_v54 }
 0x31d   : > { %v423_v59 = vmul.f32 %v420_v57, %v343_v33 }
 0x362   : > { %v426_v56 = vpop.permute.xlu2 %425 }
 0x363   : > { %v428_v58 = vmul.f32 %v426_v56, %v420_v57 }
 0x365   : > { %430 = vrot.lane.b32.xlu2 %v428_v58, %s1222_s8  ;;  %v1110_v58 = vld [vmem:[%s1289_s30 + $0x20] sm:$0xff] }
 0x366   : > { %1112 = vmatmul.msk.f32.vlgmr.msra.gmra.mxu1 %vm262_vm0, %v1110_v58 }
 0x3bf   : > { %v431_v60 = vpop.permute.xlu2 %430 }
 0x3c0   : > { %v433_v61 = vadd.f32 %v431_v60, %v423_v59 }
 0x3c2   : > { %1162 = vtanh.f32 %v433_v61 }
 0x3c8   : > { %v1163_v62 = vpop.eup %1162 }
 0x3c9   : > { %436 = vrot.lane.b32.xlu0 %v1163_v62, %s1221_s7 }
 0x3e3   : > { %v672_v60 = vpop.f32.mrf.mxu1 }
 0x43b   : > { %v437_v63 = vpop.permute.xlu0 %436 }
 0x43c   : > { %v439_v8 = vmul.f32 %v437_v63, %v420_v57 }
 0x43e   : > { %441 = vrot.lane.b32.xlu1 %v439_v8, %s1222_s8 }
 0x4b0   : > { %v442_v11 = vpop.permute.xlu1 %441 }
 0x4b1   : > { %1099 = vst.msk [vmem:[%s1358_s11 + $0x8] sm:$0xff] %vm262_vm0, %v442_v11  ;;  %1101 = vmatmul.msk.f32.vlgmr.msrb.gmra.mxu0 %vm262_vm0, %v442_v11 }
 0x4b2   : > { %826 = vmatpush.msrb.mxu0 %v1269_v0 }
 0x4b4   : > { %827 = vmatpush.msrb.mxu0 %v1273_v2 }
 0x4b6   : > { %828 = vmatpush.msrb.mxu0 %v1280_v4 }
 0x4b8   : > { %829 = vmatpush.msrb.mxu0 %v1295_v6 }
 0x52e   : > { %v467_v13 = vpop.f32.mrf.mxu0 }
 0x52f   : > { %v491_v14 = vadd.f32 %v490_v12, %v467_v13 }
 0x531   : > { %v493_v15 = vadd.f32 %v1340_v10, %v491_v14 }
 0x533   : > { %1164 = vtanh.f32 %v493_v15  ;;  %v1103_v17 = vmul.f32 -1.442695, %v493_v15 }
 0x535   : > { %1166 = vpow2.f32 %v1103_v17 }
 0x539   : > { %v1165_v16 = vpop.eup %1164 }
 0x53a   : > { %516 = vrot.lane.b32.xlu2 %v1165_v16, %s1221_s7 }
 0x53b   : > { %v1167_v18 = vpop.eup %1166 }
 0x53c   : > { %v497_v19 = vadd.f32 1.0, %v1167_v18 }
 0x53e   : > { %1168 = vrcp.f32 %v497_v19  ;;  %v509_v25 = vand.u32 2147483648, %v497_v19  ;;  %vm503_vm10 = vweird.f32 %v497_v19  ;;  %v507_v26 = vand.u32 2147483647, %v497_v19 }
 0x540   : > { %v510_v28 = vor.u32 1.1754944e-38, %v509_v25  ;;  %vm508_vm12 = vcmp.eq.f32.partialorder %v507_v26, 8.507059e+37 }
 0x544   : > { %v1169_v20 = vpop.eup %1168 }
 0x545   : > { %v499_v21 = vmul.f32 %v1169_v20, %v497_v19  ;;  %vm504_vm9 = vweird.f32 %v1169_v20 }
 0x546   : > { %vm505_vm11 = vmor %vm503_vm10, %vm504_vm9 }
 0x547   : > { %v500_v22 = vsub.f32 1.0, %v499_v21 }
 0x549   : > { %v501_v23 = vmul.f32 %v1169_v20, %v500_v22 }
 0x54b   : > { %v502_v24 = vadd.f32 %v1169_v20, %v501_v23 }
 0x54d   : > { %v506_v27 = vsel %vm505_vm11, %v1169_v20, %v502_v24 }
 0x54e   : > { %v511_v30 = vsel %vm508_vm12, %v510_v28, %v506_v27 }
 0x54f   : > { %v514_v32 = vmul.f32 %v511_v30, %v433_v61 }
 0x594   : > { %v517_v29 = vpop.permute.xlu2 %516 }
 0x595   : > { %v519_v31 = vmul.f32 %v517_v29, %v511_v30 }
 0x597   : > { %521 = vrot.lane.b32.xlu0 %v519_v31, %s1222_s8  ;;  %v1115_v31 = vld [vmem:[%s1289_s30 + $0x28] sm:$0xff] }
 0x598   : > { %1117 = vmatmul.msk.f32.vlgmr.msra.gmra.mxu3 %vm262_vm0, %v1115_v31 }
 0x609   : > { %v522_v33 = vpop.permute.xlu0 %521 }
 0x60a   : > { %v524_v34 = vadd.f32 %v522_v33, %v514_v32 }
 0x60c   : > { %1170 = vtanh.f32 %v524_v34 }
 0x612   : > { %v1171_v35 = vpop.eup %1170 }
 0x613   : > { %527 = vrot.lane.b32.xlu1 %v1171_v35, %s1221_s7 }
 0x61b   : > { %v763_v33 = vpop.f32.mrf.mxu3 }
 0x685   : > { %v528_v36 = vpop.permute.xlu1 %527 }
 0x686   : > { %v530_v37 = vmul.f32 %v528_v36, %v511_v30 }
 0x688   : > { %532 = vrot.lane.b32.xlu2 %v530_v37, %s1222_s8 }
 0x6e2   : > { %v533_v39 = vpop.permute.xlu2 %532 }
 0x6e3   : > { %1104 = vst.msk [vmem:[%s1358_s11 + $0x10] sm:$0xff] %vm262_vm0, %v533_v39  ;;  %1106 = vmatmul.msk.f32.vlgmr.msrb.gmra.mxu2 %vm262_vm0, %v533_v39 }
 0x6e4   : > { %917 = vmatpush.msrb.mxu2 %v1269_v0 }
 0x6e6   : > { %918 = vmatpush.msrb.mxu2 %v1273_v2 }
 0x6e8   : > { %919 = vmatpush.msrb.mxu2 %v1280_v4 }
 0x6ea   : > { %920 = vmatpush.msrb.mxu2 %v1295_v6 }
 0x766   : > { %v558_v40 = vpop.f32.mrf.mxu2 }
 0x767   : > { %v582_v3 = vadd.f32 %v581_v1, %v558_v40 }
 0x769   : > { %v584_v5 = vadd.f32 %v1340_v10, %v582_v3 }
 0x76b   : > { %1172 = vtanh.f32 %v584_v5  ;;  %v1108_v41 = vmul.f32 -1.442695, %v584_v5 }
 0x76d   : > { %1174 = vpow2.f32 %v1108_v41 }
 0x771   : > { %v1173_v7 = vpop.eup %1172 }
 0x772   : > { %607 = vrot.lane.b32.xlu0 %v1173_v7, %s1221_s7 }
 0x773   : > { %v1175_v42 = vpop.eup %1174 }
 0x774   : > { %v588_v43 = vadd.f32 1.0, %v1175_v42 }
 0x776   : > { %1176 = vrcp.f32 %v588_v43  ;;  %v600_v6 = vand.u32 2147483648, %v588_v43  ;;  %vm594_vm14 = vweird.f32 %v588_v43  ;;  %v598_v46 = vand.u32 2147483647, %v588_v43 }
 0x778   : > { %v601_v48 = vor.u32 1.1754944e-38, %v600_v6  ;;  %vm599_vm1 = vcmp.eq.f32.partialorder %v598_v46, 8.507059e+37 }
 0x77c   : > { %v1177_v0 = vpop.eup %1176 }
 0x77d   : > { %v590_v2 = vmul.f32 %v1177_v0, %v588_v43  ;;  %vm595_vm13 = vweird.f32 %v1177_v0 }
 0x77e   : > { %vm596_vm15 = vmor %vm594_vm14, %vm595_vm13 }
 0x77f   : > { %v591_v44 = vsub.f32 1.0, %v590_v2 }
 0x781   : > { %v592_v4 = vmul.f32 %v1177_v0, %v591_v44 }
 0x783   : > { %v593_v45 = vadd.f32 %v1177_v0, %v592_v4 }
 0x785   : > { %v597_v47 = vsel %vm596_vm15, %v1177_v0, %v593_v45 }
 0x786   : > { %v602_v50 = vsel %vm599_vm1, %v601_v48, %v597_v47 }
 0x787   : > { %v605_v52 = vmul.f32 %v602_v50, %v524_v34 }
 0x7e4   : > { %v608_v49 = vpop.permute.xlu0 %607 }
 0x7e5   : > { %v610_v51 = vmul.f32 %v608_v49, %v602_v50 }
 0x7e7   : > { %612 = vrot.lane.b32.xlu1 %v610_v51, %s1222_s8  ;;  %v1120_v51 = vld [vmem:[%s1289_s30 + $0x30] sm:$0xff] }
 0x7e8   : > { %1122 = vmatmul.msk.f32.vlgmr.msrb.gmra.mxu1 %vm262_vm0, %v1120_v51 }
 0x859   : > { %v613_v53 = vpop.permute.xlu1 %612 }
 0x85a   : > { %v615_v54 = vadd.f32 %v613_v53, %v605_v52 }
 0x85c   : > { %1178 = vtanh.f32 %v615_v54 }
 0x862   : > { %v1179_v55 = vpop.eup %1178 }
 0x863   : > { %618 = vrot.lane.b32.xlu2 %v1179_v55, %s1221_s7 }
 0x865   : > { %v854_v53 = vpop.f32.mrf.mxu1 }
 0x8bd   : > { %v619_v56 = vpop.permute.xlu2 %618 }
 0x8be   : > { %v621_v57 = vmul.f32 %v619_v56, %v602_v50 }
 0x8c0   : > { %623 = vrot.lane.b32.xlu0 %v621_v57, %s1222_s8 }
 0x932   : > { %v624_v59 = vpop.permute.xlu0 %623 }
 0x933   : > { %1109 = vst.msk [vmem:[%s1358_s11 + $0x18] sm:$0xff] %vm262_vm0, %v624_v59  ;;  %1111 = vmatmul.msk.f32.vlgmr.msra.gmra.mxu0 %vm262_vm0, %v624_v59 }
 0x9b0   : > { %v649_v61 = vpop.f32.mrf.mxu0 }
 0x9b1   : > { %v673_v62 = vadd.f32 %v672_v60, %v649_v61 }
 0x9b3   : > { %v675_v63 = vadd.f32 %v1340_v10, %v673_v62 }
 0x9b5   : > { %1180 = vtanh.f32 %v675_v63  ;;  %v1113_v9 = vmul.f32 -1.442695, %v675_v63 }
 0x9b7   : > { %1182 = vpow2.f32 %v1113_v9 }
 0x9bb   : > { %v1181_v8 = vpop.eup %1180 }
 0x9bc   : > { %698 = vrot.lane.b32.xlu1 %v1181_v8, %s1221_s7 }
 0x9bd   : > { %v1183_v11 = vpop.eup %1182 }
 0x9be   : > { %v679_v12 = vadd.f32 1.0, %v1183_v11 }
 0x9c0   : > { %1184 = vrcp.f32 %v679_v12  ;;  %v691_v18 = vand.u32 2147483648, %v679_v12  ;;  %vm685_vm3 = vweird.f32 %v679_v12  ;;  %v689_v19 = vand.u32 2147483647, %v679_v12 }
 0x9c2   : > { %v692_v21 = vor.u32 1.1754944e-38, %v691_v18  ;;  %vm690_vm5 = vcmp.eq.f32.partialorder %v689_v19, 8.507059e+37 }
 0x9c6   : > { %v1185_v13 = vpop.eup %1184 }
 0x9c7   : > { %v681_v14 = vmul.f32 %v1185_v13, %v679_v12  ;;  %vm686_vm2 = vweird.f32 %v1185_v13 }
 0x9c8   : > { %vm687_vm4 = vmor %vm685_vm3, %vm686_vm2 }
 0x9c9   : > { %v682_v15 = vsub.f32 1.0, %v681_v14 }
 0x9cb   : > { %v683_v16 = vmul.f32 %v1185_v13, %v682_v15 }
 0x9cd   : > { %v684_v17 = vadd.f32 %v1185_v13, %v683_v16 }
 0x9cf   : > { %v688_v20 = vsel %vm687_vm4, %v1185_v13, %v684_v17 }
 0x9d0   : > { %v693_v23 = vsel %vm690_vm5, %v692_v21, %v688_v20 }
 0x9d1   : > { %v696_v25 = vmul.f32 %v693_v23, %v615_v54 }
 0xa2e   : > { %v699_v22 = vpop.permute.xlu1 %698 }
 0xa2f   : > { %v701_v24 = vmul.f32 %v699_v22, %v693_v23 }
 0xa31   : > { %703 = vrot.lane.b32.xlu2 %v701_v24, %s1222_s8  ;;  %v1125_v24 = vld [vmem:[%s1289_s30 + $0x38] sm:$0xff] }
 0xa32   : > { %1127 = vmatmul.msk.f32.vlgmr.msrb.gmra.mxu3 %vm262_vm0, %v1125_v24 }
 0xa8b   : > { %v704_v26 = vpop.permute.xlu2 %703 }
 0xa8c   : > { %v706_v27 = vadd.f32 %v704_v26, %v696_v25 }
 0xa8e   : > { %1186 = vtanh.f32 %v706_v27 }
 0xa94   : > { %v1187_v28 = vpop.eup %1186 }
 0xa95   : > { %709 = vrot.lane.b32.xlu0 %v1187_v28, %s1221_s7 }
 0xab5   : > { %v945_v26 = vpop.f32.mrf.mxu3 }
 0xb07   : > { %v710_v29 = vpop.permute.xlu0 %709 }
 0xb08   : > { %v712_v30 = vmul.f32 %v710_v29, %v693_v23 }
 0xb0a   : > { %714 = vrot.lane.b32.xlu1 %v712_v30, %s1222_s8 }
 0xb7c   : > { %v715_v32 = vpop.permute.xlu1 %714 }
 0xb7d   : > { %1114 = vst.msk [vmem:[%s1358_s11 + $0x20] sm:$0xff] %vm262_vm0, %v715_v32  ;;  %1116 = vmatmul.msk.f32.vlgmr.msra.gmra.mxu2 %vm262_vm0, %v715_v32 }
 0xc00   : > { %v740_v34 = vpop.f32.mrf.mxu2 }
 0xc01   : > { %v764_v35 = vadd.f32 %v763_v33, %v740_v34 }
 0xc03   : > { %v766_v36 = vadd.f32 %v1340_v10, %v764_v35 }
 0xc05   : > { %1188 = vtanh.f32 %v766_v36  ;;  %v1118_v38 = vmul.f32 -1.442695, %v766_v36 }
 0xc07   : > { %1190 = vpow2.f32 %v1118_v38 }
 0xc0b   : > { %v1189_v37 = vpop.eup %1188 }
 0xc0c   : > { %789 = vrot.lane.b32.xlu2 %v1189_v37, %s1221_s7 }
 0xc0d   : > { %v1191_v39 = vpop.eup %1190 }
 0xc0e   : > { %v770_v1 = vadd.f32 1.0, %v1191_v39 }
 0xc10   : > { %1192 = vrcp.f32 %v770_v1  ;;  %v782_v42 = vand.u32 2147483648, %v770_v1  ;;  %vm776_vm7 = vweird.f32 %v770_v1  ;;  %v780_v43 = vand.u32 2147483647, %v770_v1 }
 0xc12   : > { %v783_v2 = vor.u32 1.1754944e-38, %v782_v42  ;;  %vm781_vm9 = vcmp.eq.f32.partialorder %v780_v43, 8.507059e+37 }
 0xc16   : > { %v1193_v40 = vpop.eup %1192 }
 0xc17   : > { %v772_v3 = vmul.f32 %v1193_v40, %v770_v1  ;;  %vm777_vm6 = vweird.f32 %v1193_v40 }
 0xc18   : > { %vm778_vm8 = vmor %vm776_vm7, %vm777_vm6 }
 0xc19   : > { %v773_v5 = vsub.f32 1.0, %v772_v3 }
 0xc1b   : > { %v774_v7 = vmul.f32 %v1193_v40, %v773_v5 }
 0xc1d   : > { %v775_v41 = vadd.f32 %v1193_v40, %v774_v7 }
 0xc1f   : > { %v779_v0 = vsel %vm778_vm8, %v1193_v40, %v775_v41 }
 0xc20   : > { %v784_v4 = vsel %vm781_vm9, %v783_v2, %v779_v0 }
 0xc21   : > { %v787_v6 = vmul.f32 %v784_v4, %v706_v27 }
 0xc66   : > { %v790_v44 = vpop.permute.xlu2 %789 }
 0xc67   : > { %v792_v45 = vmul.f32 %v790_v44, %v784_v4 }
 0xc69   : > { %794 = vrot.lane.b32.xlu0 %v792_v45, %s1222_s8 }
 0xcdb   : > { %v795_v46 = vpop.permute.xlu0 %794 }
 0xcdc   : > { %v797_v47 = vadd.f32 %v795_v46, %v787_v6 }
 0xcde   : > { %1194 = vtanh.f32 %v797_v47 }
 0xce4   : > { %v1195_v48 = vpop.eup %1194 }
 0xce5   : > { %800 = vrot.lane.b32.xlu1 %v1195_v48, %s1221_s7 }
 0xd57   : > { %v801_v49 = vpop.permute.xlu1 %800 }
 0xd58   : > { %v803_v50 = vmul.f32 %v801_v49, %v784_v4 }
 0xd5a   : > { %805 = vrot.lane.b32.xlu2 %v803_v50, %s1222_s8 }
 0xdb4   : > { %v806_v52 = vpop.permute.xlu2 %805 }
 0xdb5   : > { %1119 = vst.msk [vmem:[%s1358_s11 + $0x28] sm:$0xff] %vm262_vm0, %v806_v52  ;;  %1121 = vmatmul.msk.f32.vlgmr.msrb.gmra.mxu0 %vm262_vm0, %v806_v52 }
 0xe32   : > { %v831_v54 = vpop.f32.mrf.mxu0 }
 0xe33   : > { %v855_v55 = vadd.f32 %v854_v53, %v831_v54 }
 0xe35   : > { %v857_v56 = vadd.f32 %v1340_v10, %v855_v55 }
 0xe37   : > { %1196 = vtanh.f32 %v857_v56  ;;  %v1123_v58 = vmul.f32 -1.442695, %v857_v56 }
 0xe39   : > { %1198 = vpow2.f32 %v1123_v58 }
 0xe3d   : > { %v1197_v57 = vpop.eup %1196 }
 0xe3e   : > { %880 = vrot.lane.b32.xlu0 %v1197_v57, %s1221_s7 }
 0xe3f   : > { %v1199_v59 = vpop.eup %1198 }
 0xe40   : > { %v861_v60 = vadd.f32 1.0, %v1199_v59 }
 0xe42   : > { %1200 = vrcp.f32 %v861_v60  ;;  %v873_v11 = vand.u32 2147483648, %v861_v60  ;;  %vm867_vm11 = vweird.f32 %v861_v60  ;;  %v871_v12 = vand.u32 2147483647, %v861_v60 }
 0xe44   : > { %v874_v14 = vor.u32 1.1754944e-38, %v873_v11  ;;  %vm872_vm13 = vcmp.eq.f32.partialorder %v871_v12, 8.507059e+37 }
 0xe48   : > { %v1201_v61 = vpop.eup %1200 }
 0xe49   : > { %v863_v62 = vmul.f32 %v1201_v61, %v861_v60  ;;  %vm868_vm10 = vweird.f32 %v1201_v61 }
 0xe4a   : > { %vm869_vm12 = vmor %vm867_vm11, %vm868_vm10 }
 0xe4b   : > { %v864_v63 = vsub.f32 1.0, %v863_v62 }
 0xe4d   : > { %v865_v8 = vmul.f32 %v1201_v61, %v864_v63 }
 0xe4f   : > { %v866_v9 = vadd.f32 %v1201_v61, %v865_v8 }
 0xe51   : > { %v870_v13 = vsel %vm869_vm12, %v1201_v61, %v866_v9 }
 0xe52   : > { %v875_v16 = vsel %vm872_vm13, %v874_v14, %v870_v13 }
 0xe53   : > { %v878_v18 = vmul.f32 %v875_v16, %v797_v47 }
 0xeb0   : > { %v881_v15 = vpop.permute.xlu0 %880 }
 0xeb1   : > { %v883_v17 = vmul.f32 %v881_v15, %v875_v16 }
 0xeb3   : > { %885 = vrot.lane.b32.xlu1 %v883_v17, %s1222_s8 }
 0xf25   : > { %v886_v19 = vpop.permute.xlu1 %885 }
 0xf26   : > { %v888_v20 = vadd.f32 %v886_v19, %v878_v18 }
 0xf28   : > { %1202 = vtanh.f32 %v888_v20 }
 0xf2e   : > { %v1203_v21 = vpop.eup %1202 }
 0xf2f   : > { %891 = vrot.lane.b32.xlu2 %v1203_v21, %s1221_s7 }
 0xf89   : > { %v892_v22 = vpop.permute.xlu2 %891 }
 0xf8a   : > { %v894_v23 = vmul.f32 %v892_v22, %v875_v16 }
 0xf8c   : > { %896 = vrot.lane.b32.xlu0 %v894_v23, %s1222_s8 }
 0xffe   : > { %v897_v25 = vpop.permute.xlu0 %896 }
 0xfff   : > { %1124 = vst.msk [vmem:[%s1358_s11 + $0x30] sm:$0xff] %vm262_vm0, %v897_v25  ;;  %1126 = vmatmul.msk.f32.vlgmr.msrb.gmra.mxu2 %vm262_vm0, %v897_v25 }
0x1082   : > { %v922_v27 = vpop.f32.mrf.mxu2 }
0x1083   : > { %v946_v28 = vadd.f32 %v945_v26, %v922_v27 }
0x1085   : > { %v948_v29 = vadd.f32 %v1340_v10, %v946_v28 }
0x1087   : > { %1204 = vtanh.f32 %v948_v29  ;;  %v1128_v31 = vmul.f32 -1.442695, %v948_v29 }
0x1089   : > { %1206 = vpow2.f32 %v1128_v31 }
0x108d   : > { %v1205_v30 = vpop.eup %1204 }
0x108e   : > { %971 = vrot.lane.b32.xlu1 %v1205_v30, %s1221_s7 }
0x108f   : > { %v1207_v32 = vpop.eup %1206 }
0x1090   : > { %v952_v33 = vadd.f32 1.0, %v1207_v32 }
0x1092   : > { %1208 = vrcp.f32 %v952_v33  ;;  %v964_v39 = vand.u32 2147483648, %v952_v33  ;;  %vm958_vm15 = vweird.f32 %v952_v33  ;;  %v962_v1 = vand.u32 2147483647, %v952_v33 }
0x1094   : > { %v965_v40 = vor.u32 1.1754944e-38, %v964_v39  ;;  %vm963_vm2 = vcmp.eq.f32.partialorder %v962_v1, 8.507059e+37 }
0x1098   : > { %v1209_v34 = vpop.eup %1208 }
0x1099   : > { %v954_v35 = vmul.f32 %v1209_v34, %v952_v33  ;;  %vm959_vm14 = vweird.f32 %v1209_v34 }
0x109a   : > { %vm960_vm1 = vmor %vm958_vm15, %vm959_vm14 }
0x109b   : > { %v955_v36 = vsub.f32 1.0, %v954_v35 }
0x109d   : > { %v956_v37 = vmul.f32 %v1209_v34, %v955_v36 }
0x109f   : > { %v957_v38 = vadd.f32 %v1209_v34, %v956_v37 }
0x10a1   : > { %v961_v10 = vsel %vm960_vm1, %v1209_v34, %v957_v38 }
0x10a2   : > { %v966_v5 = vsel %vm963_vm2, %v965_v40, %v961_v10 }
0x10a3   : > { %v969_v41 = vmul.f32 %v966_v5, %v888_v20 }
0x1100   : > { %v972_v3 = vpop.permute.xlu1 %971 }
0x1101   : > { %v974_v7 = vmul.f32 %v972_v3, %v966_v5 }
0x1103   : > { %976 = vrot.lane.b32.xlu2 %v974_v7, %s1222_s8 }
0x115d   : > { %v977_v42 = vpop.permute.xlu2 %976 }
0x115e   : > { %v979_v43 = vadd.f32 %v977_v42, %v969_v41 }
0x1160   : > { %1210 = vtanh.f32 %v979_v43 }
0x1166   : > { %v1211_v0 = vpop.eup %1210 }
0x1167   : > { %982 = vrot.lane.b32.xlu0 %v1211_v0, %s1221_s7 }
0x11d9   : > { %v983_v2 = vpop.permute.xlu0 %982 }
0x11da   : > { %v985_v44 = vmul.f32 %v983_v2, %v966_v5 }
0x11dc   : > { %987 = vrot.lane.b32.xlu1 %v985_v44, %s1222_s8 }
0x124e   : > { %v988_v4 = vpop.permute.xlu1 %987 }
0x124f   : > { %1129 = vst.msk [vmem:[%s1358_s11 + $0x38] sm:$0xff] %vm262_vm0, %v988_v4 }
0x1250 PF: > { %s14_s15 = sadd.s32 1, %s1218_s15  }
0x1251   : > { %p11_p4 = scmp.ge.s32.totalorder %s14_s15, 4  }
0x1253   :  { %13 = sbr.rel (!%p11_p4) target bundleno = 1 (0x1), region = 89 }

// kernel: lstm_forward.4
= control target key start
LH: loop header
LB: loop body
LE: loop exit
PB: predicated region body
PF: predicated region fallthrough
CT: control target
= control target key end

     0   :  { %s1253_s15 = smov 0   ;;  %s1509_s0 = inlined_call_operand.vmem [shape: f32[2,8,8,64], index: 0, kind: input, shape index: {}]   ;;  %s1510_s1 = inlined_call_operand.vmem [shape: f32[2,64,128], index: 1, kind: input, shape index: {}]   ;;  %s1511_s2 = inlined_call_operand.vmem [shape: f32[2,32,128], index: 2, kind: input, shape index: {}]   ;;  %s1512_s3 = inlined_call_operand.vmem [shape: f32[2,1,128], index: 3, kind: input, shape index: {}]   ;;  %s1513_s4 = inlined_call_operand.vmem [shape: f32[2,8,8,32], index: 4, kind: output, shape index: {}]  }
   0x1 LB: > { %s1085_s16 = sadd.s32 4294967295, %s1223_s15   ;;  %p1089_p0 = scmp.ge.s32.totalorder %s1223_s15, 1  ;;  %s1223_s15 = sphi %s1253_s15, %s14_s15  }
   0x2   : > { %p190_p1 = scmp.lt.s32.totalorder %s1223_s15, 3 }
   0x4   : > { %p191_p2 = pnand %p1089_p0, %p190_p1 }
   0x5   : > { %p229_p3 = scmp.lt.s32.totalorder (!%p191_p2), %s1085_s16, 1  ;;  %s1226_s7 = smov (!%p191_p2), 64  }
   0x6   : > { %194 = sbr.rel (%p191_p2) target bundleno = 4695 (0x1257), region = 36  ;;  %s1227_s8 = smov (!%p191_p2), 32  }
   0xb   : > { %s1515_s16 = smov (!%p229_p3, %s1085_s16), 1  ;;  %v1225_v10 = vmov 0.0   ;;  %vm290_vm0 = vcmask 523264   ;;  %vm266_vm5 = vcmask 261120  }
   0xc   : > { %s1264_s17 = sshll.u32 %s1515_s16, 6  ;;  %s1139_s18 = sshll.u32 %s1515_s16, 5 }
   0xd   : > { %s1271_s21 = scalar_lea.vmem %s1510_s1, %s1264_s17  ;;  %s243_s24 = scalar_lea.vmem %s1511_s2, %s1139_s18 }
   0xe   : > { %v1277_v0 = vld [vmem:[%s1271_s21 + $0x38] sm:$0xff]  ;;  %v1280_v1 = vld [vmem:[%s1271_s21 + $0x30] sm:$0xff]  ;;  %v1287_v3 = vld [vmem:[%s1271_s21 + $0x28] sm:$0xff]  ;;  %s246_s27 = scalar_lea.vmem %s1512_s3, %s1515_s16  ;;  %s1330_s30 = scalar_lea.vmem %s1509_s0, %s1264_s17 }
   0xf   : > { %302 = vmatpush.msra.mxu1 %v1277_v0  ;;  %v1283_v2 = vld [vmem:[%s243_s24 + $0x18] sm:$0xff]  ;;  %395 = vmatpush.msra.mxu3 %v1277_v0  ;;  %v1290_v4 = vld [vmem:[%s243_s24 + $0x10] sm:$0xff]  ;;  %v1294_v5 = vld [vmem:[%s243_s24 + $0x8] sm:$0xff]  ;;  %s1406_s11 = scalar_lea.vmem %s1513_s4, %s1264_s17 }
  0x10   : > { %282 = vmatpush.msra.mxu0 %v1283_v2  ;;  %376 = vmatpush.msra.mxu2 %v1283_v2  ;;  %v1298_v6 = vld [vmem:[%s1271_s21 + $0x20] sm:$0xff]  ;;  %v1307_v8 = vld [vmem:[%s1271_s21 + $0x18] sm:$0xff]  ;;  %v1318_v9 = vld [vmem:[%s1271_s21 + $0x10] sm:$0xff] }
  0x11   : > { %303 = vmatpush.msra.mxu1 %v1280_v1  ;;  %396 = vmatpush.msra.mxu3 %v1280_v1  ;;  %v1303_v7 = vld [vmem:[%s243_s24] sm:$0xff]  ;;  %v1324_v11 = vld [vmem:[%s1271_s21 + $0x8] sm:$0xff] }
  0x12   : > { %283 = vmatpush.msra.mxu0 %v1290_v4  ;;  %377 = vmatpush.msra.mxu2 %v1290_v4  ;;  %v1337_v12 = vld [vmem:[%s1271_s21] sm:$0xff]  ;;  %v1100_v41 = vld [vmem:[%s1330_s30 + $0x8] sm:$0xff] }
  0x13   : > { %304 = vmatpush.msra.mxu1 %v1287_v3  ;;  %397 = vmatpush.msra.mxu3 %v1287_v3  ;;  %v265_v13 = vld [vmem:[%s1330_s30] sm:$0xff] }
  0x14   : > { %284 = vmatpush.msra.mxu0 %v1294_v5  ;;  %378 = vmatpush.msra.mxu2 %v1294_v5  ;;  %v1385_v15 = vld [vmem:[%s246_s27] ss:$0 sm:$0xff] }
  0x15   : > { %305 = vmatpush.msra.mxu1 %v1298_v6  ;;  %398 = vmatpush.msra.mxu3 %v1298_v6 }
  0x16   : > { %285 = vmatpush.msra.mxu0 %v1303_v7  ;;  %379 = vmatpush.msra.mxu2 %v1303_v7 }
  0x17   : > { %306 = vmatpush.msra.mxu1 %v1307_v8  ;;  %286 = vmatmul.f32.vlgmr.msra.gmra.mxu0 %v1225_v10 }
  0x18   : > { %399 = vmatpush.msra.mxu3 %v1307_v8  ;;  %486 = vmatpush.msrb.mxu2 %v1277_v0 }
  0x19   : > { %307 = vmatpush.msra.mxu1 %v1318_v9  ;;  %467 = vmatpush.msrb.mxu0 %v1283_v2 }
  0x1a   : > { %400 = vmatpush.msra.mxu3 %v1318_v9  ;;  %487 = vmatpush.msrb.mxu2 %v1280_v1 }
  0x1b   : > { %308 = vmatpush.msra.mxu1 %v1324_v11  ;;  %468 = vmatpush.msrb.mxu0 %v1290_v4 }
  0x1c   : > { %401 = vmatpush.msra.mxu3 %v1324_v11  ;;  %488 = vmatpush.msrb.mxu2 %v1287_v3 }
  0x1d   : > { %309 = vmatpush.msra.mxu1 %v1337_v12  ;;  %469 = vmatpush.msrb.mxu0 %v1294_v5 }
  0x1e   : > { %1098 = vmatmul.msk.f32.vlgmr.msra.gmra.mxu1 %vm290_vm0, %v265_v13  ;;  %402 = vmatpush.msra.mxu3 %v1337_v12 }
  0x1f   : > { %489 = vmatpush.msrb.mxu2 %v1298_v6  ;;  %470 = vmatpush.msrb.mxu0 %v1303_v7 }
  0x20   : > { %577 = vmatpush.msrb.mxu1 %v1277_v0  ;;  %649 = vmatpush.msrb.mxu3 %v1283_v2 }
  0x21   : > { %558 = vmatpush.msra.mxu0 %v1283_v2  ;;  %490 = vmatpush.msrb.mxu2 %v1307_v8 }
  0x22   : > { %578 = vmatpush.msrb.mxu1 %v1280_v1  ;;  %650 = vmatpush.msrb.mxu3 %v1290_v4 }
  0x23   : > { %559 = vmatpush.msra.mxu0 %v1290_v4  ;;  %491 = vmatpush.msrb.mxu2 %v1318_v9 }
  0x24   : > { %579 = vmatpush.msrb.mxu1 %v1287_v3  ;;  %651 = vmatpush.msrb.mxu3 %v1294_v5 }
  0x25   : > { %560 = vmatpush.msra.mxu0 %v1294_v5  ;;  %492 = vmatpush.msrb.mxu2 %v1324_v11 }
  0x26   : > { %580 = vmatpush.msrb.mxu1 %v1298_v6  ;;  %652 = vmatpush.msrb.mxu3 %v1303_v7 }
  0x27   : > { %561 = vmatpush.msra.mxu0 %v1303_v7  ;;  %493 = vmatpush.msrb.mxu2 %v1337_v12 }
  0x28   : > { %581 = vmatpush.msrb.mxu1 %v1307_v8  ;;  %1102 = vmatmul.msk.f32.vlgmr.msra.gmra.mxu3 %vm290_vm0, %v1100_v41 }
  0x29   : > { %759 = vmatpush.msra.mxu3 %v1277_v0 }
  0x2a   : > { %582 = vmatpush.msrb.mxu1 %v1318_v9 }
  0x2b   : > { %760 = vmatpush.msra.mxu3 %v1280_v1 }
  0x2c   : > { %583 = vmatpush.msrb.mxu1 %v1324_v11 }
  0x2d   : > { %761 = vmatpush.msra.mxu3 %v1287_v3 }
  0x2e   : > { %584 = vmatpush.msrb.mxu1 %v1337_v12 }
  0x2f   : > { %762 = vmatpush.msra.mxu3 %v1298_v6 }
  0x30   : > { %941 = vmatpush.msra.mxu1 %v1277_v0 }
  0x31   : > { %763 = vmatpush.msra.mxu3 %v1307_v8 }
  0x32   : > { %942 = vmatpush.msra.mxu1 %v1280_v1 }
  0x33   : > { %764 = vmatpush.msra.mxu3 %v1318_v9 }
  0x34   : > { %943 = vmatpush.msra.mxu1 %v1287_v3 }
  0x35   : > { %765 = vmatpush.msra.mxu3 %v1324_v11 }
  0x36   : > { %944 = vmatpush.msra.mxu1 %v1298_v6 }
  0x37   : > { %766 = vmatpush.msra.mxu3 %v1337_v12 }
  0x38   : > { %945 = vmatpush.msra.mxu1 %v1307_v8 }
  0x3a   : > { %946 = vmatpush.msra.mxu1 %v1318_v9 }
  0x3c   : > { %947 = vmatpush.msra.mxu1 %v1324_v11 }
  0x3e   : > { %948 = vmatpush.msra.mxu1 %v1337_v12 }
  0x94   : > { %v287_v14 = vpop.f32.mrf.mxu0 }
  0x9b   : > { %v311_v16 = vpop.f32.mrf.mxu1 }
  0x9c   : > { %v312_v17 = vadd.f32 %v311_v16, %v287_v14  ;;  %v1105_v16 = vld [vmem:[%s1330_s30 + $0x10] sm:$0xff] }
  0x9e   : > { %v317_v18 = vadd.f32 %v1385_v15, %v312_v17 }
  0xa0   : > { %1153 = vtanh.f32 %v317_v18  ;;  %v1099_v20 = vmul.f32 -1.442695, %v317_v18 }
  0xa2   : > { %1155 = vpow2.f32 %v1099_v20 }
  0xa6   : > { %v1154_v19 = vpop.eup %1153 }
  0xa7   : > { %340 = vrot.lane.b32.xlu0 %v1154_v19, %s1226_s7 }
  0xa8   : > { %v1156_v21 = vpop.eup %1155 }
  0xa9   : > { %v321_v22 = vadd.f32 1.0, %v1156_v21 }
  0xab   : > { %1157 = vrcp.f32 %v321_v22  ;;  %v333_v28 = vand.u32 2147483648, %v321_v22  ;;  %vm327_vm2 = vweird.f32 %v321_v22  ;;  %v331_v29 = vand.u32 2147483647, %v321_v22  ;;  %v404_v43 = vpop.f32.mrf.mxu3 }
  0xad   : > { %v334_v31 = vor.u32 1.1754944e-38, %v333_v28  ;;  %vm332_vm4 = vcmp.eq.f32.partialorder %v331_v29, 8.507059e+37 }
  0xb1   : > { %v1158_v23 = vpop.eup %1157 }
  0xb2   : > { %v323_v24 = vmul.f32 %v1158_v23, %v321_v22  ;;  %vm328_vm1 = vweird.f32 %v1158_v23 }
  0xb3   : > { %vm329_vm3 = vmor %vm327_vm2, %vm328_vm1 }
  0xb4   : > { %v324_v25 = vsub.f32 1.0, %v323_v24 }
  0xb6   : > { %v325_v26 = vmul.f32 %v1158_v23, %v324_v25 }
  0xb8   : > { %v326_v27 = vadd.f32 %v1158_v23, %v325_v26 }
  0xba   : > { %v330_v30 = vsel %vm329_vm3, %v1158_v23, %v326_v27 }
  0xbb   : > { %v335_v33 = vsel %vm332_vm4, %v334_v31, %v330_v30 }
  0xbc   : > { %v338_v35 = vmul.f32 0.0, %v335_v33 }
 0x119   : > { %v341_v32 = vpop.permute.xlu0 %340 }
 0x11a   : > { %v343_v34 = vmul.f32 %v341_v32, %v335_v33 }
 0x11c   : > { %345 = vrot.lane.b32.xlu0 %v343_v34, %s1227_s8 }
 0x18e   : > { %v346_v36 = vpop.permute.xlu0 %345 }
 0x18f   : > { %v348_v37 = vadd.f32 %v346_v36, %v338_v35 }
 0x191   : > { %1159 = vtanh.f32 %v348_v37 }
 0x197   : > { %v1160_v38 = vpop.eup %1159 }
 0x198   : > { %351 = vrot.lane.b32.xlu1 %v1160_v38, %s1226_s7  ;;  %v1110_v38 = vld [vmem:[%s1330_s30 + $0x18] sm:$0xff] }
 0x199   : > { %1112 = vmatmul.msk.f32.vlgmr.msrb.gmra.mxu1 %vm290_vm0, %v1110_v38 }
 0x20a   : > { %v352_v39 = vpop.permute.xlu1 %351 }
 0x20b   : > { %v354_v40 = vmul.f32 %v352_v39, %v335_v33 }
 0x20d   : > { %356 = vrot.lane.b32.xlu1 %v354_v40, %s1227_s8 }
 0x216   : > { %v586_v40 = vpop.f32.mrf.mxu1 }
 0x27f   : > { %v357_v42 = vpop.permute.xlu1 %356 }
 0x280   : > { %359 = vst.msk [vmem:[%s1406_s11] sm:$0xff] %vm266_vm5, %v357_v42  ;;  %1101 = vmatmul.msk.f32.vlgmr.msra.gmra.mxu2 %vm266_vm5, %v357_v42 }
 0x281   : > { %740 = vmatpush.msra.mxu2 %v1283_v2 }
 0x283   : > { %741 = vmatpush.msra.mxu2 %v1290_v4 }
 0x285   : > { %742 = vmatpush.msra.mxu2 %v1294_v5 }
 0x287   : > { %743 = vmatpush.msra.mxu2 %v1303_v7 }
 0x288   : > { %1107 = vmatmul.msk.f32.vlgmr.msrb.gmra.mxu2 %vm290_vm0, %v1105_v16 }
 0x289   : > { %850 = vmatpush.msrb.mxu2 %v1277_v0 }
 0x28b   : > { %851 = vmatpush.msrb.mxu2 %v1280_v1 }
 0x28d   : > { %852 = vmatpush.msrb.mxu2 %v1287_v3 }
 0x28f   : > { %853 = vmatpush.msrb.mxu2 %v1298_v6 }
 0x291   : > { %854 = vmatpush.msrb.mxu2 %v1307_v8 }
 0x293   : > { %855 = vmatpush.msrb.mxu2 %v1318_v9 }
 0x295   : > { %856 = vmatpush.msrb.mxu2 %v1324_v11 }
 0x297   : > { %857 = vmatpush.msrb.mxu2 %v1337_v12 }
 0x303   : > { %v381_v44 = vpop.f32.mrf.mxu2 }
 0x304   : > { %v405_v45 = vadd.f32 %v404_v43, %v381_v44 }
 0x306   : > { %v407_v46 = vadd.f32 %v1385_v15, %v405_v45 }
 0x308   : > { %1161 = vtanh.f32 %v407_v46  ;;  %v1103_v48 = vmul.f32 -1.442695, %v407_v46 }
 0x30a   : > { %1163 = vpow2.f32 %v1103_v48 }
 0x30b   : > { %v495_v20 = vpop.f32.mrf.mxu2 }
 0x30e   : > { %v1162_v47 = vpop.eup %1161 }
 0x30f   : > { %430 = vrot.lane.b32.xlu2 %v1162_v47, %s1226_s7 }
 0x310   : > { %v1164_v49 = vpop.eup %1163 }
 0x311   : > { %v411_v50 = vadd.f32 1.0, %v1164_v49 }
 0x313   : > { %1165 = vrcp.f32 %v411_v50  ;;  %v423_v56 = vand.u32 2147483648, %v411_v50  ;;  %vm417_vm7 = vweird.f32 %v411_v50  ;;  %v421_v57 = vand.u32 2147483647, %v411_v50 }
 0x315   : > { %v424_v59 = vor.u32 1.1754944e-38, %v423_v56  ;;  %vm422_vm9 = vcmp.eq.f32.partialorder %v421_v57, 8.507059e+37 }
 0x319   : > { %v1166_v51 = vpop.eup %1165 }
 0x31a   : > { %v413_v52 = vmul.f32 %v1166_v51, %v411_v50  ;;  %vm418_vm6 = vweird.f32 %v1166_v51 }
 0x31b   : > { %vm419_vm8 = vmor %vm417_vm7, %vm418_vm6 }
 0x31c   : > { %v414_v53 = vsub.f32 1.0, %v413_v52 }
 0x31e   : > { %v415_v54 = vmul.f32 %v1166_v51, %v414_v53 }
 0x320   : > { %v416_v55 = vadd.f32 %v1166_v51, %v415_v54 }
 0x322   : > { %v420_v58 = vsel %vm419_vm8, %v1166_v51, %v416_v55 }
 0x323   : > { %v425_v61 = vsel %vm422_vm9, %v424_v59, %v420_v58 }
 0x324   : > { %v428_v63 = vmul.f32 %v425_v61, %v348_v37 }
 0x369   : > { %v431_v60 = vpop.permute.xlu2 %430 }
 0x36a   : > { %v433_v62 = vmul.f32 %v431_v60, %v425_v61 }
 0x36c   : > { %435 = vrot.lane.b32.xlu2 %v433_v62, %s1227_s8 }
 0x3c6   : > { %v436_v10 = vpop.permute.xlu2 %435 }
 0x3c7   : > { %v438_v13 = vadd.f32 %v436_v10, %v428_v63 }
 0x3c9   : > { %1167 = vtanh.f32 %v438_v13 }
 0x3cf   : > { %v1168_v14 = vpop.eup %1167 }
 0x3d0   : > { %441 = vrot.lane.b32.xlu0 %v1168_v14, %s1226_s7  ;;  %v1115_v14 = vld [vmem:[%s1330_s30 + $0x20] sm:$0xff] }
 0x442   : > { %v442_v17 = vpop.permute.xlu0 %441 }
 0x443   : > { %v444_v18 = vmul.f32 %v442_v17, %v425_v61 }
 0x445   : > { %446 = vrot.lane.b32.xlu1 %v444_v18, %s1227_s8 }
 0x4b7   : > { %v447_v19 = vpop.permute.xlu1 %446 }
 0x4b8   : > { %1104 = vst.msk [vmem:[%s1406_s11 + $0x8] sm:$0xff] %vm266_vm5, %v447_v19  ;;  %1106 = vmatmul.msk.f32.vlgmr.msrb.gmra.mxu0 %vm266_vm5, %v447_v19 }
 0x4b9   : > { %668 = vmatpush.msrb.mxu0 %v1277_v0 }
 0x4bb   : > { %669 = vmatpush.msrb.mxu0 %v1280_v1 }
 0x4bd   : > { %670 = vmatpush.msrb.mxu0 %v1287_v3 }
 0x4bf   : > { %671 = vmatpush.msrb.mxu0 %v1298_v6 }
 0x4c1   : > { %672 = vmatpush.msrb.mxu0 %v1307_v8 }
 0x4c3   : > { %673 = vmatpush.msrb.mxu0 %v1318_v9 }
 0x4c5   : > { %674 = vmatpush.msrb.mxu0 %v1324_v11 }
 0x4c7   : > { %675 = vmatpush.msrb.mxu0 %v1337_v12 }
 0x535   : > { %v472_v21 = vpop.f32.mrf.mxu0 }
 0x536   : > { %v496_v22 = vadd.f32 %v495_v20, %v472_v21 }
 0x538   : > { %v498_v23 = vadd.f32 %v1385_v15, %v496_v22 }
 0x53a   : > { %1169 = vtanh.f32 %v498_v23  ;;  %v1108_v1 = vmul.f32 -1.442695, %v498_v23 }
 0x53c   : > { %1171 = vpow2.f32 %v1108_v1 }
 0x540   : > { %v1170_v0 = vpop.eup %1169 }
 0x541   : > { %521 = vrot.lane.b32.xlu2 %v1170_v0, %s1226_s7 }
 0x542   : > { %v1172_v3 = vpop.eup %1171 }
 0x543   : > { %v502_v6 = vadd.f32 1.0, %v1172_v3 }
 0x545   : > { %1173 = vrcp.f32 %v502_v6  ;;  %v514_v12 = vand.u32 2147483648, %v502_v6  ;;  %vm508_vm11 = vweird.f32 %v502_v6  ;;  %v512_v26 = vand.u32 2147483647, %v502_v6 }
 0x547   : > { %v515_v28 = vor.u32 1.1754944e-38, %v514_v12  ;;  %vm513_vm13 = vcmp.eq.f32.partialorder %v512_v26, 8.507059e+37 }
 0x54b   : > { %v1174_v8 = vpop.eup %1173 }
 0x54c   : > { %v504_v9 = vmul.f32 %v1174_v8, %v502_v6  ;;  %vm509_vm10 = vweird.f32 %v1174_v8 }
 0x54d   : > { %vm510_vm12 = vmor %vm508_vm11, %vm509_vm10 }
 0x54e   : > { %v505_v24 = vsub.f32 1.0, %v504_v9 }
 0x550   : > { %v506_v11 = vmul.f32 %v1174_v8, %v505_v24 }
 0x552   : > { %v507_v25 = vadd.f32 %v1174_v8, %v506_v11 }
 0x554   : > { %v511_v27 = vsel %vm510_vm12, %v1174_v8, %v507_v25 }
 0x555   : > { %v516_v30 = vsel %vm513_vm13, %v515_v28, %v511_v27 }
 0x556   : > { %v519_v32 = vmul.f32 %v516_v30, %v438_v13 }
 0x59b   : > { %v522_v29 = vpop.permute.xlu2 %521 }
 0x59c   : > { %v524_v31 = vmul.f32 %v522_v29, %v516_v30 }
 0x59e   : > { %526 = vrot.lane.b32.xlu0 %v524_v31, %s1227_s8  ;;  %v1120_v31 = vld [vmem:[%s1330_s30 + $0x28] sm:$0xff] }
 0x610   : > { %v527_v33 = vpop.permute.xlu0 %526 }
 0x611   : > { %v529_v34 = vadd.f32 %v527_v33, %v519_v32 }
 0x613   : > { %1175 = vtanh.f32 %v529_v34 }
 0x619   : > { %v1176_v35 = vpop.eup %1175 }
 0x61a   : > { %532 = vrot.lane.b32.xlu1 %v1176_v35, %s1226_s7 }
 0x68c   : > { %v533_v36 = vpop.permute.xlu1 %532 }
 0x68d   : > { %v535_v37 = vmul.f32 %v533_v36, %v516_v30 }
 0x68f   : > { %537 = vrot.lane.b32.xlu2 %v535_v37, %s1227_s8 }
 0x6e9   : > { %v538_v39 = vpop.permute.xlu2 %537 }
 0x6ea   : > { %1109 = vst.msk [vmem:[%s1406_s11 + $0x10] sm:$0xff] %vm266_vm5, %v538_v39  ;;  %1111 = vmatmul.msk.f32.vlgmr.msra.gmra.mxu0 %vm266_vm5, %v538_v39 }
 0x6eb   : > { %922 = vmatpush.msra.mxu0 %v1283_v2 }
 0x6ed   : > { %923 = vmatpush.msra.mxu0 %v1290_v4 }
 0x6ef   : > { %924 = vmatpush.msra.mxu0 %v1294_v5 }
 0x6f1   : > { %925 = vmatpush.msra.mxu0 %v1303_v7 }
 0x6f2   : > { %1117 = vmatmul.msk.f32.vlgmr.msrb.gmra.mxu0 %vm290_vm0, %v1115_v14 }
 0x767   : > { %v563_v41 = vpop.f32.mrf.mxu0 }
 0x768   : > { %v587_v42 = vadd.f32 %v586_v40, %v563_v41 }
 0x76a   : > { %v589_v43 = vadd.f32 %v1385_v15, %v587_v42 }
 0x76c   : > { %1177 = vtanh.f32 %v589_v43  ;;  %v1113_v45 = vmul.f32 -1.442695, %v589_v43 }
 0x76e   : > { %1179 = vpow2.f32 %v1113_v45 }
 0x76f   : > { %v677_v17 = vpop.f32.mrf.mxu0 }
 0x772   : > { %v1178_v44 = vpop.eup %1177 }
 0x773   : > { %612 = vrot.lane.b32.xlu0 %v1178_v44, %s1226_s7 }
 0x774   : > { %v1180_v46 = vpop.eup %1179 }
 0x775   : > { %v593_v47 = vadd.f32 1.0, %v1180_v46 }
 0x777   : > { %1181 = vrcp.f32 %v593_v47  ;;  %v605_v53 = vand.u32 2147483648, %v593_v47  ;;  %vm599_vm15 = vweird.f32 %v593_v47  ;;  %v603_v54 = vand.u32 2147483647, %v593_v47 }
 0x779   : > { %v606_v56 = vor.u32 1.1754944e-38, %v605_v53  ;;  %vm604_vm2 = vcmp.eq.f32.partialorder %v603_v54, 8.507059e+37 }
 0x77d   : > { %v1182_v48 = vpop.eup %1181 }
 0x77e   : > { %v595_v49 = vmul.f32 %v1182_v48, %v593_v47  ;;  %vm600_vm14 = vweird.f32 %v1182_v48 }
 0x77f   : > { %vm601_vm1 = vmor %vm599_vm15, %vm600_vm14 }
 0x780   : > { %v596_v50 = vsub.f32 1.0, %v595_v49 }
 0x782   : > { %v597_v51 = vmul.f32 %v1182_v48, %v596_v50 }
 0x784   : > { %v598_v52 = vadd.f32 %v1182_v48, %v597_v51 }
 0x786   : > { %v602_v55 = vsel %vm601_vm1, %v1182_v48, %v598_v52 }
 0x787   : > { %v607_v58 = vsel %vm604_vm2, %v606_v56, %v602_v55 }
 0x788   : > { %v610_v60 = vmul.f32 %v607_v58, %v529_v34 }
 0x7e5   : > { %v613_v57 = vpop.permute.xlu0 %612 }
 0x7e6   : > { %v615_v59 = vmul.f32 %v613_v57, %v607_v58 }
 0x7e8   : > { %617 = vrot.lane.b32.xlu1 %v615_v59, %s1227_s8  ;;  %v1125_v59 = vld [vmem:[%s1330_s30 + $0x30] sm:$0xff] }
 0x85a   : > { %v618_v61 = vpop.permute.xlu1 %617 }
 0x85b   : > { %v620_v62 = vadd.f32 %v618_v61, %v610_v60 }
 0x85d   : > { %1183 = vtanh.f32 %v620_v62 }
 0x863   : > { %v1184_v63 = vpop.eup %1183 }
 0x864   : > { %623 = vrot.lane.b32.xlu2 %v1184_v63, %s1226_s7 }
 0x8be   : > { %v624_v10 = vpop.permute.xlu2 %623 }
 0x8bf   : > { %v626_v13 = vmul.f32 %v624_v10, %v607_v58 }
 0x8c1   : > { %628 = vrot.lane.b32.xlu0 %v626_v13, %s1227_s8 }
 0x933   : > { %v629_v16 = vpop.permute.xlu0 %628 }
 0x934   : > { %1114 = vst.msk [vmem:[%s1406_s11 + $0x18] sm:$0xff] %vm266_vm5, %v629_v16  ;;  %1116 = vmatmul.msk.f32.vlgmr.msrb.gmra.mxu3 %vm266_vm5, %v629_v16 }
 0x935   : > { %831 = vmatpush.msrb.mxu3 %v1283_v2 }
 0x937   : > { %832 = vmatpush.msrb.mxu3 %v1290_v4 }
 0x939   : > { %833 = vmatpush.msrb.mxu3 %v1294_v5 }
 0x93b   : > { %834 = vmatpush.msrb.mxu3 %v1303_v7 }
 0x93c   : > { %1122 = vmatmul.msk.f32.vlgmr.msra.gmra.mxu3 %vm290_vm0, %v1120_v31 }
 0x9b7   : > { %v654_v18 = vpop.f32.mrf.mxu3 }
 0x9b8   : > { %v678_v19 = vadd.f32 %v677_v17, %v654_v18 }
 0x9ba   : > { %v680_v20 = vadd.f32 %v1385_v15, %v678_v19 }
 0x9bc   : > { %1185 = vtanh.f32 %v680_v20  ;;  %v1118_v22 = vmul.f32 -1.442695, %v680_v20 }
 0x9be   : > { %1187 = vpow2.f32 %v1118_v22 }
 0x9bf   : > { %v768_v33 = vpop.f32.mrf.mxu3 }
 0x9c2   : > { %v1186_v21 = vpop.eup %1185 }
 0x9c3   : > { %703 = vrot.lane.b32.xlu1 %v1186_v21, %s1226_s7 }
 0x9c4   : > { %v1188_v23 = vpop.eup %1187 }
 0x9c5   : > { %v684_v0 = vadd.f32 1.0, %v1188_v23 }
 0x9c7   : > { %1189 = vrcp.f32 %v684_v0  ;;  %v696_v7 = vand.u32 2147483648, %v684_v0  ;;  %vm690_vm4 = vweird.f32 %v684_v0  ;;  %v694_v6 = vand.u32 2147483647, %v684_v0 }
 0x9c9   : > { %v697_v9 = vor.u32 1.1754944e-38, %v696_v7  ;;  %vm695_vm7 = vcmp.eq.f32.partialorder %v694_v6, 8.507059e+37 }
 0x9cd   : > { %v1190_v2 = vpop.eup %1189 }
 0x9ce   : > { %v686_v4 = vmul.f32 %v1190_v2, %v684_v0  ;;  %vm691_vm3 = vweird.f32 %v1190_v2 }
 0x9cf   : > { %vm692_vm6 = vmor %vm690_vm4, %vm691_vm3 }
 0x9d0   : > { %v687_v1 = vsub.f32 1.0, %v686_v4 }
 0x9d2   : > { %v688_v5 = vmul.f32 %v1190_v2, %v687_v1 }
 0x9d4   : > { %v689_v3 = vadd.f32 %v1190_v2, %v688_v5 }
 0x9d6   : > { %v693_v8 = vsel %vm692_vm6, %v1190_v2, %v689_v3 }
 0x9d7   : > { %v698_v11 = vsel %vm695_vm7, %v697_v9, %v693_v8 }
 0x9d8   : > { %v701_v12 = vmul.f32 %v698_v11, %v620_v62 }
 0xa35   : > { %v704_v24 = vpop.permute.xlu1 %703 }
 0xa36   : > { %v706_v25 = vmul.f32 %v704_v24, %v698_v11 }
 0xa38   : > { %708 = vrot.lane.b32.xlu2 %v706_v25, %s1227_s8  ;;  %v1130_v25 = vld [vmem:[%s1330_s30 + $0x38] sm:$0xff] }
 0xa39   : > { %1132 = vmatmul.msk.f32.vlgmr.msra.gmra.mxu1 %vm290_vm0, %v1130_v25 }
 0xa92   : > { %v709_v26 = vpop.permute.xlu2 %708 }
 0xa93   : > { %v711_v27 = vadd.f32 %v709_v26, %v701_v12 }
 0xa95   : > { %1191 = vtanh.f32 %v711_v27 }
 0xa9b   : > { %v1192_v28 = vpop.eup %1191 }
 0xa9c   : > { %714 = vrot.lane.b32.xlu0 %v1192_v28, %s1226_s7 }
 0xab6   : > { %v950_v26 = vpop.f32.mrf.mxu1 }
 0xb0e   : > { %v715_v29 = vpop.permute.xlu0 %714 }
 0xb0f   : > { %v717_v30 = vmul.f32 %v715_v29, %v698_v11 }
 0xb11   : > { %719 = vrot.lane.b32.xlu1 %v717_v30, %s1227_s8 }
 0xb83   : > { %v720_v32 = vpop.permute.xlu1 %719 }
 0xb84   : > { %1119 = vst.msk [vmem:[%s1406_s11 + $0x20] sm:$0xff] %vm266_vm5, %v720_v32  ;;  %1121 = vmatmul.msk.f32.vlgmr.msra.gmra.mxu2 %vm266_vm5, %v720_v32 }
 0xb8c   : > { %1127 = vmatmul.msk.f32.vlgmr.msrb.gmra.mxu2 %vm290_vm0, %v1125_v59 }
 0xc07   : > { %v745_v34 = vpop.f32.mrf.mxu2 }
 0xc08   : > { %v769_v35 = vadd.f32 %v768_v33, %v745_v34 }
 0xc0a   : > { %v771_v36 = vadd.f32 %v1385_v15, %v769_v35 }
 0xc0c   : > { %1193 = vtanh.f32 %v771_v36  ;;  %v1123_v38 = vmul.f32 -1.442695, %v771_v36 }
 0xc0e   : > { %1195 = vpow2.f32 %v1123_v38 }
 0xc0f   : > { %v859_v61 = vpop.f32.mrf.mxu2 }
 0xc12   : > { %v1194_v37 = vpop.eup %1193 }
 0xc13   : > { %794 = vrot.lane.b32.xlu2 %v1194_v37, %s1226_s7 }
 0xc14   : > { %v1196_v39 = vpop.eup %1195 }
 0xc15   : > { %v775_v40 = vadd.f32 1.0, %v1196_v39 }
 0xc17   : > { %1197 = vrcp.f32 %v775_v40  ;;  %v787_v46 = vand.u32 2147483648, %v775_v40  ;;  %vm781_vm9 = vweird.f32 %v775_v40  ;;  %v785_v47 = vand.u32 2147483647, %v775_v40 }
 0xc19   : > { %v788_v49 = vor.u32 1.1754944e-38, %v787_v46  ;;  %vm786_vm11 = vcmp.eq.f32.partialorder %v785_v47, 8.507059e+37 }
 0xc1d   : > { %v1198_v41 = vpop.eup %1197 }
 0xc1e   : > { %v777_v42 = vmul.f32 %v1198_v41, %v775_v40  ;;  %vm782_vm8 = vweird.f32 %v1198_v41 }
 0xc1f   : > { %vm783_vm10 = vmor %vm781_vm9, %vm782_vm8 }
 0xc20   : > { %v778_v43 = vsub.f32 1.0, %v777_v42 }
 0xc22   : > { %v779_v44 = vmul.f32 %v1198_v41, %v778_v43 }
 0xc24   : > { %v780_v45 = vadd.f32 %v1198_v41, %v779_v44 }
 0xc26   : > { %v784_v48 = vsel %vm783_vm10, %v1198_v41, %v780_v45 }
 0xc27   : > { %v789_v51 = vsel %vm786_vm11, %v788_v49, %v784_v48 }
 0xc28   : > { %v792_v53 = vmul.f32 %v789_v51, %v711_v27 }
 0xc6d   : > { %v795_v50 = vpop.permute.xlu2 %794 }
 0xc6e   : > { %v797_v52 = vmul.f32 %v795_v50, %v789_v51 }
 0xc70   : > { %799 = vrot.lane.b32.xlu0 %v797_v52, %s1227_s8 }
 0xce2   : > { %v800_v54 = vpop.permute.xlu0 %799 }
 0xce3   : > { %v802_v55 = vadd.f32 %v800_v54, %v792_v53 }
 0xce5   : > { %1199 = vtanh.f32 %v802_v55 }
 0xceb   : > { %v1200_v56 = vpop.eup %1199 }
 0xcec   : > { %805 = vrot.lane.b32.xlu1 %v1200_v56, %s1226_s7 }
 0xd5e   : > { %v806_v57 = vpop.permute.xlu1 %805 }
 0xd5f   : > { %v808_v58 = vmul.f32 %v806_v57, %v789_v51 }
 0xd61   : > { %810 = vrot.lane.b32.xlu2 %v808_v58, %s1227_s8 }
 0xdbb   : > { %v811_v60 = vpop.permute.xlu2 %810 }
 0xdbc   : > { %1124 = vst.msk [vmem:[%s1406_s11 + $0x28] sm:$0xff] %vm266_vm5, %v811_v60  ;;  %1126 = vmatmul.msk.f32.vlgmr.msrb.gmra.mxu3 %vm266_vm5, %v811_v60 }
 0xe3f   : > { %v836_v62 = vpop.f32.mrf.mxu3 }
 0xe40   : > { %v860_v63 = vadd.f32 %v859_v61, %v836_v62 }
 0xe42   : > { %v862_v10 = vadd.f32 %v1385_v15, %v860_v63 }
 0xe44   : > { %1201 = vtanh.f32 %v862_v10  ;;  %v1128_v14 = vmul.f32 -1.442695, %v862_v10 }
 0xe46   : > { %1203 = vpow2.f32 %v1128_v14 }
 0xe4a   : > { %v1202_v13 = vpop.eup %1201 }
 0xe4b   : > { %885 = vrot.lane.b32.xlu0 %v1202_v13, %s1226_s7 }
 0xe4c   : > { %v1204_v16 = vpop.eup %1203 }
 0xe4d   : > { %v866_v17 = vadd.f32 1.0, %v1204_v16 }
 0xe4f   : > { %1205 = vrcp.f32 %v866_v17  ;;  %v878_v23 = vand.u32 2147483648, %v866_v17  ;;  %vm872_vm13 = vweird.f32 %v866_v17  ;;  %v876_v0 = vand.u32 2147483647, %v866_v17 }
 0xe51   : > { %v879_v4 = vor.u32 1.1754944e-38, %v878_v23  ;;  %vm877_vm15 = vcmp.eq.f32.partialorder %v876_v0, 8.507059e+37 }
 0xe55   : > { %v1206_v18 = vpop.eup %1205 }
 0xe56   : > { %v868_v19 = vmul.f32 %v1206_v18, %v866_v17  ;;  %vm873_vm12 = vweird.f32 %v1206_v18 }
 0xe57   : > { %vm874_vm14 = vmor %vm872_vm13, %vm873_vm12 }
 0xe58   : > { %v869_v20 = vsub.f32 1.0, %v868_v19 }
 0xe5a   : > { %v870_v21 = vmul.f32 %v1206_v18, %v869_v20 }
 0xe5c   : > { %v871_v22 = vadd.f32 %v1206_v18, %v870_v21 }
 0xe5e   : > { %v875_v2 = vsel %vm874_vm14, %v1206_v18, %v871_v22 }
 0xe5f   : > { %v880_v5 = vsel %vm877_vm15, %v879_v4, %v875_v2 }
 0xe60   : > { %v883_v7 = vmul.f32 %v880_v5, %v802_v55 }
 0xebd   : > { %v886_v1 = vpop.permute.xlu0 %885 }
 0xebe   : > { %v888_v3 = vmul.f32 %v886_v1, %v880_v5 }
 0xec0   : > { %890 = vrot.lane.b32.xlu1 %v888_v3, %s1227_s8 }
 0xf32   : > { %v891_v6 = vpop.permute.xlu1 %890 }
 0xf33   : > { %v893_v8 = vadd.f32 %v891_v6, %v883_v7 }
 0xf35   : > { %1207 = vtanh.f32 %v893_v8 }
 0xf3b   : > { %v1208_v9 = vpop.eup %1207 }
 0xf3c   : > { %896 = vrot.lane.b32.xlu2 %v1208_v9, %s1226_s7 }
 0xf96   : > { %v897_v24 = vpop.permute.xlu2 %896 }
 0xf97   : > { %v899_v11 = vmul.f32 %v897_v24, %v880_v5 }
 0xf99   : > { %901 = vrot.lane.b32.xlu0 %v899_v11, %s1227_s8 }
0x100b   : > { %v902_v12 = vpop.permute.xlu0 %901 }
0x100c   : > { %1129 = vst.msk [vmem:[%s1406_s11 + $0x30] sm:$0xff] %vm266_vm5, %v902_v12  ;;  %1131 = vmatmul.msk.f32.vlgmr.msra.gmra.mxu0 %vm266_vm5, %v902_v12 }
0x1089   : > { %v927_v27 = vpop.f32.mrf.mxu0 }
0x108a   : > { %v951_v28 = vadd.f32 %v950_v26, %v927_v27 }
0x108c   : > { %v953_v29 = vadd.f32 %v1385_v15, %v951_v28 }
0x108e   : > { %1209 = vtanh.f32 %v953_v29  ;;  %v1133_v31 = vmul.f32 -1.442695, %v953_v29 }
0x1090   : > { %1211 = vpow2.f32 %v1133_v31 }
0x1094   : > { %v1210_v30 = vpop.eup %1209 }
0x1095   : > { %976 = vrot.lane.b32.xlu1 %v1210_v30, %s1226_s7 }
0x1096   : > { %v1212_v32 = vpop.eup %1211 }
0x1097   : > { %v957_v33 = vadd.f32 1.0, %v1212_v32 }
0x1099   : > { %1213 = vrcp.f32 %v957_v33  ;;  %v969_v39 = vand.u32 2147483648, %v957_v33  ;;  %vm963_vm1 = vweird.f32 %v957_v33  ;;  %v967_v40 = vand.u32 2147483647, %v957_v33 }
0x109b   : > { %v970_v41 = vor.u32 1.1754944e-38, %v969_v39  ;;  %vm968_vm3 = vcmp.eq.f32.partialorder %v967_v40, 8.507059e+37 }
0x109f   : > { %v1214_v34 = vpop.eup %1213 }
0x10a0   : > { %v959_v35 = vmul.f32 %v1214_v34, %v957_v33  ;;  %vm964_vm0 = vweird.f32 %v1214_v34 }
0x10a1   : > { %vm965_vm2 = vmor %vm963_vm1, %vm964_vm0 }
0x10a2   : > { %v960_v36 = vsub.f32 1.0, %v959_v35 }
0x10a4   : > { %v961_v37 = vmul.f32 %v1214_v34, %v960_v36 }
0x10a6   : > { %v962_v38 = vadd.f32 %v1214_v34, %v961_v37 }
0x10a8   : > { %v966_v15 = vsel %vm965_vm2, %v1214_v34, %v962_v38 }
0x10a9   : > { %v971_v43 = vsel %vm968_vm3, %v970_v41, %v966_v15 }
0x10aa   : > { %v974_v45 = vmul.f32 %v971_v43, %v893_v8 }
0x1107   : > { %v977_v42 = vpop.permute.xlu1 %976 }
0x1108   : > { %v979_v44 = vmul.f32 %v977_v42, %v971_v43 }
0x110a   : > { %981 = vrot.lane.b32.xlu2 %v979_v44, %s1227_s8 }
0x1164   : > { %v982_v46 = vpop.permute.xlu2 %981 }
0x1165   : > { %v984_v47 = vadd.f32 %v982_v46, %v974_v45 }
0x1167   : > { %1215 = vtanh.f32 %v984_v47 }
0x116d   : > { %v1216_v48 = vpop.eup %1215 }
0x116e   : > { %987 = vrot.lane.b32.xlu0 %v1216_v48, %s1226_s7 }
0x11e0   : > { %v988_v49 = vpop.permute.xlu0 %987 }
0x11e1   : > { %v990_v50 = vmul.f32 %v988_v49, %v971_v43 }
0x11e3   : > { %992 = vrot.lane.b32.xlu1 %v990_v50, %s1227_s8 }
0x1255   : > { %v993_v51 = vpop.permute.xlu1 %992 }
0x1256   : > { %1134 = vst.msk [vmem:[%s1406_s11 + $0x38] sm:$0xff] %vm266_vm5, %v993_v51 }
0x1257 PF: > { %s14_s15 = sadd.s32 1, %s1223_s15  }
0x1258   : > { %p11_p4 = scmp.ge.s32.totalorder %s14_s15, 4  }
0x125a   :  { %13 = sbr.rel (!%p11_p4) target bundleno = 1 (0x1), region = 89 }

</bundles_post_ra>
